<compile_context>
chip_gen: v7x
topology: tpu7x:2x2x1
jax: 0.10.0
libtpu: 0.0.40
codegen_flags: <defaults>
</compile_context>

<pallas_src>
import functools

import jax
import jax.numpy as jnp
from jax.experimental import pallas as pl
from jax.experimental.pallas import tpu as pltpu

NULL_IDX = 0
TEMPERATURE = 1.0
_NEG = -1e30  # finite "-inf" sentinel (Python float -> jaxpr literal, never a captured const)


def corge_kernel(scores_ref, labels_ref, llsum_ref, m_ref, l_ref, lab_ref, *,
                 null_idx, vocab_size, v_tile, seqlen, cands_per_tile, num_cands):
    # scores_ref: (1, rows, v_tile) native dtype     labels_ref: (1, rows, 1) int32
    # llsum_ref:  (1, 1, 1, C) f32  per-(batch, row-tile) partial ll sums
    # scratch m/l/lab: (rows, 1) f32  -- running max / running sum(exp) / label raw score
    r = pl.program_id(1)
    v = pl.program_id(2)
    n_v = pl.num_programs(2)
    rows = cands_per_tile * seqlen

    @pl.when(v == 0)
    def _():
        m_ref[...] = jnp.full_like(m_ref, _NEG)
        l_ref[...] = jnp.zeros_like(l_ref)
        lab_ref[...] = jnp.zeros_like(lab_ref)

    s = scores_ref[0].astype(jnp.float32)            # (rows, v_tile)  in-kernel cast
    lbl = labels_ref[0]                              # (rows, 1) int32

    # Chunk-local lane index only (no full-tile `v*v_tile + iota` add): compare against the
    # chunk-local label column instead.
    col = jax.lax.broadcasted_iota(jnp.int32, (rows, v_tile), 1)
    local_lbl = lbl - v * v_tile                     # scalar shift per chunk

    # Raw score at the label position (exactly one chunk contains it per row).
    lab_ref[...] = lab_ref[...] + jnp.sum(
        jnp.where(col == local_lbl, s, 0.0), axis=-1, keepdims=True)

    # ---- online log-sum-exp over the vocab axis ----
    def lse_update(s_lse):
        chunk_max = jnp.max(s_lse, axis=-1, keepdims=True)        # (rows, 1)
        m_prev = m_ref[...]
        m_new = jnp.maximum(m_prev, chunk_max)
        l_ref[...] = (l_ref[...] * jnp.exp(m_prev - m_new)
                      + jnp.sum(jnp.exp(s_lse - m_new), axis=-1, keepdims=True))
        m_ref[...] = m_new

    if vocab_size % v_tile != 0:
        tail_valid = vocab_size % v_tile             # static Python int

        @pl.when(v < n_v - 1)                        # untouched fast path
        def _():
            lse_update(s)

        @pl.when(v == n_v - 1)                       # mask only the padded tail chunk
        def _():
            lse_update(jnp.where(col < tail_valid, s, _NEG))
    else:
        lse_update(s)

    # ---- per-(batch, row-tile) finalize: NLL per token -> per-candidate sums ----
    @pl.when(v == n_v - 1)
    def _():
        lse = m_ref[...] + jnp.log(l_ref[...])                    # (rows, 1)
        label_lp = lab_ref[...] - lse                             # log_softmax at label
        nll = jnp.where(lbl != null_idx, -label_lp, 0.0)          # ignore_index masking

        # Fold this tile's rows into their GLOBAL candidate lanes without any transpose:
        # group[i, c] = 1 iff row i of this tile belongs to candidate c.
        row_i = jax.lax.broadcasted_iota(jnp.int32, (rows, num_cands), 0)
        cand_c = jax.lax.broadcasted_iota(jnp.int32, (rows, num_cands), 1)
        lo = (cand_c - r * cands_per_tile) * seqlen
        group = jnp.logical_and(row_i >= lo, row_i < lo + seqlen)
        llsum_ref[0, 0] = jnp.sum(jnp.where(group, nll, 0.0), axis=0, keepdims=True)


def _budgets():
    """Generation-aware (per-buffer scores tile budget, vmem_limit_bytes)."""
    try:
        info = pltpu.get_tpu_info()
        cap = int(getattr(info, "vmem_capacity_bytes", 64 * 1024 * 1024))
    except Exception:
        cap = 64 * 1024 * 1024                       # conservative (v7x-class) fallback
    if cap >= 128 * 1024 * 1024:                     # v5e / v6e: 128 MiB physical VMEM
        return 8 * 1024 * 1024, 64 * 1024 * 1024
    return 8 * 1024 * 1024, 48 * 1024 * 1024         # v7x: 64 MiB per TensorCore


def _choose_tiles(C, S, V, itemsize, target_tile_bytes):
    """Pick (cands_per_tile, vocab_tile).

    Prefer growing the vocab (lane) tile first -- it lengthens each row's contiguous DMA
    segment and cuts online-LSE rescale steps -- then grow rows (whole candidates) into
    whatever budget remains.
    """
    row_align = max(8, 32 // max(1, itemsize))       # 8 f32, 16 bf16, 32 for 8-bit
    divisors = [c for c in range(1, C + 1) if C % c == 0]
    legal_cpts = [c for c in divisors if (c * S) % row_align == 0 or c == C]
    min_cpt = legal_cpts[0]
    min_rows = min_cpt * S

    budget_lanes = max(128, target_tile_bytes // max(1, min_rows * itemsize))
    if V <= budget_lanes:
        v_tile = V                                   # whole vocab in a single chunk
    else:
        v_tile = min((budget_lanes // 128) * 128, 8192)
        v_tile = max(v_tile, 512 if V >= 512 else 128)   # never drop to tiny lane DMAs

    cpt = min_cpt
    for c in legal_cpts:                             # ascending; keep the largest that fits
        if c * S * v_tile * itemsize <= target_tile_bytes:
            cpt = c
    return cpt, v_tile


def corge_loss(scores, candidate_scores, labels, *, null_idx=NULL_IDX,
               temp=TEMPERATURE, cands_per_tile=None, vocab_tile=None,
               vmem_limit_bytes=None, target_tile_bytes=None):
    B, C, S, V = scores.shape
    CS = C * S
    itemsize = jnp.dtype(scores.dtype).itemsize

    auto_budget, auto_vmem = _budgets()
    if target_tile_bytes is None:
        target_tile_bytes = auto_budget
    if vmem_limit_bytes is None:
        vmem_limit_bytes = auto_vmem

    auto_cpt, auto_vt = _choose_tiles(C, S, V, itemsize, target_tile_bytes)
    cpt = auto_cpt if cands_per_tile is None else cands_per_tile
    v_tile = auto_vt if vocab_tile is None else vocab_tile

    row_align = max(8, 32 // max(1, itemsize))
    rows = cpt * S
    assert C % cpt == 0, "cands_per_tile must divide num_cands"
    assert rows == CS or rows % row_align == 0, "row tile must be sublane-aligned"
    assert v_tile == V or v_tile % 128 == 0, "vocab tile must be a multiple of 128"

    num_row_tiles = C // cpt
    num_v_tiles = pl.cdiv(V, v_tile)

    # Free, same-dtype reshapes only: no f32 copy of scores materialized in HBM.
    scores3 = scores.reshape(B, CS, V)
    labels3 = labels.astype(jnp.int32).reshape(B, CS, 1)

    kernel = functools.partial(
        corge_kernel, null_idx=null_idx, vocab_size=V, v_tile=v_tile,
        seqlen=S, cands_per_tile=cpt, num_cands=C)

    # Per-(batch, row-tile) partial ll sums; (1,1,1,C) blocks keep the last two block dims
    # equal to the full array dims (no sublane-misaligned output blocks).
    partial_llsum = pl.pallas_call(
        kernel,
        out_shape=jax.ShapeDtypeStruct((B, num_row_tiles, 1, C), jnp.float32),
        grid_spec=pltpu.PrefetchScalarGridSpec(
            num_scalar_prefetch=0,
            grid=(B, num_row_tiles, num_v_tiles),
            in_specs=[
                pl.BlockSpec((1, rows, v_tile), lambda b, r, v: (b, r, v)),
                pl.BlockSpec((1, rows, 1), lambda b, r, v: (b, r, 0)),
            ],
            out_specs=pl.BlockSpec((1, 1, 1, C), lambda b, r, v: (b, r, 0, 0)),
            scratch_shapes=[
                pltpu.VMEM((rows, 1), jnp.float32),   # running max
                pltpu.VMEM((rows, 1), jnp.float32),   # running sum(exp)
                pltpu.VMEM((rows, 1), jnp.float32),   # label raw score
            ],
        ),
        compiler_params=pltpu.CompilerParams(
            dimension_semantics=("parallel", "parallel", "arbitrary"),
            vmem_limit_bytes=vmem_limit_bytes,
        ),
    )(scores3, labels3)

    # Tiny (B, C)-sized epilogue in plain JAX (keeps the kernel's parallel axes clean).
    ll_loss_sum = jnp.sum(partial_llsum[:, :, 0, :], axis=1)           # (B, C)
    cand_ls = jax.nn.log_softmax(candidate_scores.astype(jnp.float32) / temp, axis=-1)
    marg = cand_ls - ll_loss_sum                                        # log_likelihood = -nll
    final_loss = -jax.scipy.special.logsumexp(marg, axis=-1)            # (B,)
    return final_loss, ll_loss_sum


def corge_loss_ref(scores, candidate_scores, labels, *, null_idx=NULL_IDX,
                   temp=TEMPERATURE):
    """Pure-JAX reference mirroring the PyTorch module."""
    logprobs = jax.nn.log_softmax(scores.astype(jnp.float32), axis=-1)
    label_lp = jnp.take_along_axis(logprobs, labels[..., None], axis=-1)[..., 0]
    ll_loss = jnp.where(labels != null_idx, -label_lp, 0.0)   # [B, C, S]
    log_likelihood = -ll_loss
    cand_ls = jax.nn.log_softmax(candidate_scores.astype(jnp.float32) / temp, axis=-1)
    marg = log_likelihood.sum(-1) + cand_ls                   # [B, C]
    final = -jax.scipy.special.logsumexp(marg, axis=-1)       # [B]
    return final, ll_loss.sum(-1)


if __name__ == "__main__":
    # --- test 1: f32 scores, automatic tiling (full-V lane tile, all candidates per tile) ---
    B, C, S, V = 2, 4, 16, 512
    k1, k2, k3 = jax.random.split(jax.random.PRNGKey(0), 3)
    scores = jax.random.normal(k1, (B, C, S, V), dtype=jnp.float32)
    candidate_scores = jax.random.normal(k2, (B, C), dtype=jnp.float32)
    labels = jax.random.randint(k3, (B, C, S), 1, V, dtype=jnp.int32)
    labels = labels.at[:, :, -3:].set(NULL_IDX)   # exercise ignore_index masking

    final_loss, ll_loss_sum = corge_loss(scores, candidate_scores, labels)
    jax.block_until_ready((final_loss, ll_loss_sum))
    final_ref, ll_ref = corge_loss_ref(scores, candidate_scores, labels)
    assert final_loss.shape == (B,) and ll_loss_sum.shape == (B, C)
    assert jnp.allclose(final_loss, final_ref, atol=1e-4, rtol=1e-4)
    assert jnp.allclose(ll_loss_sum, ll_ref, atol=1e-4, rtol=1e-4)

    # --- test 2: native bf16 scores (no wrapper upcast) + V not a multiple of 128 ---
    B2, C2, S2, V2 = 2, 4, 8, 200
    kk1, kk2, kk3 = jax.random.split(jax.random.PRNGKey(1), 3)
    scores_bf = jax.random.normal(kk1, (B2, C2, S2, V2),
                                  dtype=jnp.float32).astype(jnp.bfloat16)
    cand_bf = jax.random.normal(kk2, (B2, C2), dtype=jnp.float32)
    labels_bf = jax.random.randint(kk3, (B2, C2, S2), 1, V2, dtype=jnp.int32)
    labels_bf = labels_bf.at[:, :, -2:].set(NULL_IDX)
    f2, l2 = corge_loss(scores_bf, cand_bf, labels_bf)   # full-dim lane block (200)
    jax.block_until_ready((f2, l2))
    f2r, l2r = corge_loss_ref(scores_bf, cand_bf, labels_bf)
    assert jnp.allclose(f2, f2r, atol=5e-3, rtol=5e-3)
    assert jnp.allclose(l2, l2r, atol=5e-3, rtol=5e-3)

    # --- test 3: streamed vocab with a masked tail chunk + multiple row tiles ---
    B3, C3, S3, V3 = 2, 4, 16, 600
    m1, m2, m3 = jax.random.split(jax.random.PRNGKey(2), 3)
    scores_t3 = jax.random.normal(m1, (B3, C3, S3, V3), dtype=jnp.float32)
    cand_t3 = jax.random.normal(m2, (B3, C3), dtype=jnp.float32)
    labels_t3 = jax.random.randint(m3, (B3, C3, S3), 1, V3, dtype=jnp.int32)
    labels_t3 = labels_t3.at[:, :, -3:].set(NULL_IDX)
    f3, l3 = corge_loss(scores_t3, cand_t3, labels_t3,
                        cands_per_tile=2, vocab_tile=256)   # 3 vocab chunks, tail masked
    jax.block_until_ready((f3, l3))
    f3r, l3r = corge_loss_ref(scores_t3, cand_t3, labels_t3)
    assert jnp.allclose(f3, f3r, atol=1e-4, rtol=1e-4)
    assert jnp.allclose(l3, l3r, atol=1e-4, rtol=1e-4)

    print("KERNEL_OK")
</pallas_src>

<mosaic_0001>
module attributes {stable_mosaic.version = 11 : i64} {
  func.func @corge_kernel(%arg0: i32, %arg1: i32, %arg2: i32, %arg3: memref<1x64x512xf32, #tpu.memory_space<vmem>>, %arg4: memref<1x64x1xi32, #tpu.memory_space<vmem>>, %arg5: memref<1x1x1x4xf32, #tpu.memory_space<vmem>>, %arg6: memref<64x1xf32, #tpu.memory_space<vmem>>, %arg7: memref<64x1xf32, #tpu.memory_space<vmem>>, %arg8: memref<64x1xf32, #tpu.memory_space<vmem>>) attributes {dimension_semantics = [#tpu.dimension_semantics<parallel>, #tpu.dimension_semantics<parallel>, #tpu.dimension_semantics<arbitrary>], iteration_bounds = array<i64: 2, 1, 1>, scalar_prefetch = 0 : i64, scratch_operands = 3 : i64, tpu.core_type = #tpu.core_type<tc>, window_params = [{transform_indices = @transform_0, window_bounds = array<i64: 1, 64, 512>}, {transform_indices = @transform_1, window_bounds = array<i64: 1, 64, 1>}, {transform_indices = @transform_2, window_bounds = array<i64: 1, 1, 1, 4>}]} {
    %c0_i32 = arith.constant 0 : i32
    %0 = arith.cmpi eq, %arg2, %c0_i32 : i32
    %1 = arith.extui %0 : i1 to i32
    %c0_i32_0 = arith.constant 0 : i32
    %2 = arith.cmpi ne, %1, %c0_i32_0 : i32
    scf.if %2 {
      %cst_23 = arith.constant -1.000000e+30 : f32
      %39 = vector.broadcast %cst_23 : f32 to vector<64x1xf32>
      %c0_24 = arith.constant 0 : index
      %c0_25 = arith.constant 0 : index
      %40 = vector.load %arg6[%c0_24, %c0_25] : memref<64x1xf32, #tpu.memory_space<vmem>>, vector<64x1xf32>
      tpu.vector_store %arg6[%c0_24, %c0_25], %39 {strides = array<i32>} : memref<64x1xf32, #tpu.memory_space<vmem>>, vector<64x1xf32>,
      %cst_26 = arith.constant 0.000000e+00 : f32
      %41 = vector.broadcast %cst_26 : f32 to vector<64x1xf32>
      %c0_27 = arith.constant 0 : index
      %c0_28 = arith.constant 0 : index
      %42 = vector.load %arg7[%c0_27, %c0_28] : memref<64x1xf32, #tpu.memory_space<vmem>>, vector<64x1xf32>
      tpu.vector_store %arg7[%c0_27, %c0_28], %41 {strides = array<i32>} : memref<64x1xf32, #tpu.memory_space<vmem>>, vector<64x1xf32>,
      %cst_29 = arith.constant 0.000000e+00 : f32
      %43 = vector.broadcast %cst_29 : f32 to vector<64x1xf32>
      %c0_30 = arith.constant 0 : index
      %c0_31 = arith.constant 0 : index
      %44 = vector.load %arg8[%c0_30, %c0_31] : memref<64x1xf32, #tpu.memory_space<vmem>>, vector<64x1xf32>
      tpu.vector_store %arg8[%c0_30, %c0_31], %43 {strides = array<i32>} : memref<64x1xf32, #tpu.memory_space<vmem>>, vector<64x1xf32>,
    } else {
    }
    %c0 = arith.constant 0 : index
    %c0_1 = arith.constant 0 : index
    %c0_2 = arith.constant 0 : index
    %3 = vector.load %arg3[%c0, %c0_1, %c0_2] : memref<1x64x512xf32, #tpu.memory_space<vmem>>, vector<1x64x512xf32>
    %4 = vector.shape_cast %3 : vector<1x64x512xf32> to vector<64x512xf32>
    %c0_3 = arith.constant 0 : index
    %c0_4 = arith.constant 0 : index
    %c0_5 = arith.constant 0 : index
    %5 = vector.load %arg4[%c0_3, %c0_4, %c0_5] : memref<1x64x1xi32, #tpu.memory_space<vmem>>, vector<1x64x1xi32>
    %6 = vector.shape_cast %5 : vector<1x64x1xi32> to vector<64x1xi32>
    %7 = tpu.iota {dimensions = array<i32: 1>} : vector<64x512xi32>
    %c512_i32 = arith.constant 512 : i32
    %8 = arith.muli %arg2, %c512_i32 : i32
    %9 = vector.broadcast %8 : i32 to vector<64x1xi32>
    %10 = arith.subi %6, %9 : vector<64x1xi32>
    %c0_6 = arith.constant 0 : index
    %c0_7 = arith.constant 0 : index
    %11 = vector.load %arg8[%c0_6, %c0_7] : memref<64x1xf32, #tpu.memory_space<vmem>>, vector<64x1xf32>
    %12 = vector.broadcast %10 : vector<64x1xi32> to vector<64x512xi32>
    %13 = arith.cmpi eq, %7, %12 : vector<64x512xi32>
    %cst = arith.constant 0.000000e+00 : f32
    %14 = vector.broadcast %cst : f32 to vector<64x512xf32>
    %15 = arith.select %13, %4, %14 : vector<64x512xi1>, vector<64x512xf32>
    %cst_8 = arith.constant dense<0.000000e+00> : vector<64xf32>
    %16 = vector.multi_reduction <add>, %15, %cst_8 [1] : vector<64x512xf32> to vector<64xf32>
    %17 = vector.shape_cast %16 : vector<64xf32> to vector<64x1xf32>
    %18 = arith.addf %11, %17 : vector<64x1xf32>
    %c0_9 = arith.constant 0 : index
    %c0_10 = arith.constant 0 : index
    %19 = vector.load %arg8[%c0_9, %c0_10] : memref<64x1xf32, #tpu.memory_space<vmem>>, vector<64x1xf32>
    tpu.vector_store %arg8[%c0_9, %c0_10], %18 {strides = array<i32>} : memref<64x1xf32, #tpu.memory_space<vmem>>, vector<64x1xf32>,
    %cst_11 = arith.constant dense<0xFF800000> : vector<64xf32>
    %20 = vector.multi_reduction <maximumf>, %4, %cst_11 [1] : vector<64x512xf32> to vector<64xf32>
    %21 = vector.shape_cast %20 : vector<64xf32> to vector<64x1xf32>
    %c0_12 = arith.constant 0 : index
    %c0_13 = arith.constant 0 : index
    %22 = vector.load %arg6[%c0_12, %c0_13] : memref<64x1xf32, #tpu.memory_space<vmem>>, vector<64x1xf32>
    %23 = arith.maximumf %22, %21 : vector<64x1xf32>
    %c0_14 = arith.constant 0 : index
    %c0_15 = arith.constant 0 : index
    %24 = vector.load %arg7[%c0_14, %c0_15] : memref<64x1xf32, #tpu.memory_space<vmem>>, vector<64x1xf32>
    %25 = arith.subf %22, %23 : vector<64x1xf32>
    %26 = math.exp %25 : vector<64x1xf32>
    %27 = arith.mulf %24, %26 : vector<64x1xf32>
    %28 = vector.broadcast %23 : vector<64x1xf32> to vector<64x512xf32>
    %29 = arith.subf %4, %28 : vector<64x512xf32>
    %30 = math.exp %29 : vector<64x512xf32>
    %cst_16 = arith.constant dense<0.000000e+00> : vector<64xf32>
    %31 = vector.multi_reduction <add>, %30, %cst_16 [1] : vector<64x512xf32> to vector<64xf32>
    %32 = vector.shape_cast %31 : vector<64xf32> to vector<64x1xf32>
    %33 = arith.addf %27, %32 : vector<64x1xf32>
    %c0_17 = arith.constant 0 : index
    %c0_18 = arith.constant 0 : index
    %34 = vector.load %arg7[%c0_17, %c0_18] : memref<64x1xf32, #tpu.memory_space<vmem>>, vector<64x1xf32>
    tpu.vector_store %arg7[%c0_17, %c0_18], %33 {strides = array<i32>} : memref<64x1xf32, #tpu.memory_space<vmem>>, vector<64x1xf32>,
    %c0_19 = arith.constant 0 : index
    %c0_20 = arith.constant 0 : index
    %35 = vector.load %arg6[%c0_19, %c0_20] : memref<64x1xf32, #tpu.memory_space<vmem>>, vector<64x1xf32>
    tpu.vector_store %arg6[%c0_19, %c0_20], %23 {strides = array<i32>} : memref<64x1xf32, #tpu.memory_space<vmem>>, vector<64x1xf32>,
    %c0_i32_21 = arith.constant 0 : i32
    %36 = arith.cmpi eq, %arg2, %c0_i32_21 : i32
    %37 = arith.extui %36 : i1 to i32
    %c0_i32_22 = arith.constant 0 : i32
    %38 = arith.cmpi ne, %37, %c0_i32_22 : i32
    scf.if %38 {
      %c0_23 = arith.constant 0 : index
      %c0_24 = arith.constant 0 : index
      %39 = vector.load %arg6[%c0_23, %c0_24] : memref<64x1xf32, #tpu.memory_space<vmem>>, vector<64x1xf32>
      %c0_25 = arith.constant 0 : index
      %c0_26 = arith.constant 0 : index
      %40 = vector.load %arg7[%c0_25, %c0_26] : memref<64x1xf32, #tpu.memory_space<vmem>>, vector<64x1xf32>
      %41 = math.log %40 : vector<64x1xf32>
      %42 = arith.addf %39, %41 : vector<64x1xf32>
      %c0_27 = arith.constant 0 : index
      %c0_28 = arith.constant 0 : index
      %43 = vector.load %arg8[%c0_27, %c0_28] : memref<64x1xf32, #tpu.memory_space<vmem>>, vector<64x1xf32>
      %44 = arith.subf %43, %42 : vector<64x1xf32>
      %c0_i32_29 = arith.constant 0 : i32
      %45 = vector.broadcast %c0_i32_29 : i32 to vector<64x1xi32>
      %46 = arith.cmpi ne, %6, %45 : vector<64x1xi32>
      %cst_30 = arith.constant 0.000000e+00 : f32
      %47 = vector.broadcast %cst_30 : f32 to vector<64x1xf32>
      %48 = arith.subf %47, %44 : vector<64x1xf32>
      %cst_31 = arith.constant 0.000000e+00 : f32
      %49 = vector.broadcast %cst_31 : f32 to vector<64x1xf32>
      %50 = arith.select %46, %48, %49 : vector<64x1xi1>, vector<64x1xf32>
      %51 = tpu.iota {dimensions = array<i32: 0>} : vector<64x4xi32>
      %52 = tpu.iota {dimensions = array<i32: 1>} : vector<64x4xi32>
      %c4_i32 = arith.constant 4 : i32
      %53 = arith.muli %arg1, %c4_i32 : i32
      %54 = vector.broadcast %53 : i32 to vector<64x4xi32>
      %55 = arith.subi %52, %54 : vector<64x4xi32>
      %c16_i32 = arith.constant 16 : i32
      %56 = vector.broadcast %c16_i32 : i32 to vector<64x4xi32>
      %57 = arith.muli %55, %56 : vector<64x4xi32>
      %58 = arith.cmpi sge, %51, %57 : vector<64x4xi32>
      %c16_i32_32 = arith.constant 16 : i32
      %59 = vector.broadcast %c16_i32_32 : i32 to vector<64x4xi32>
      %60 = arith.addi %57, %59 : vector<64x4xi32>
      %61 = arith.cmpi slt, %51, %60 : vector<64x4xi32>
      %62 = arith.andi %58, %61 : vector<64x4xi1>
      %cst_33 = arith.constant 0.000000e+00 : f32
      %63 = vector.shape_cast %50 : vector<64x1xf32> to vector<64x1xf32>
      %64 = vector.broadcast %63 : vector<64x1xf32> to vector<64x4xf32>
      %65 = vector.broadcast %cst_33 : f32 to vector<64x4xf32>
      %66 = arith.select %62, %64, %65 : vector<64x4xi1>, vector<64x4xf32>
      %cst_34 = arith.constant dense<0.000000e+00> : vector<4xf32>
      %67 = vector.multi_reduction <add>, %66, %cst_34 [0] : vector<64x4xf32> to vector<4xf32>
      %68 = vector.shape_cast %67 : vector<4xf32> to vector<1x4xf32>
      %c0_35 = arith.constant 0 : index
      %c0_36 = arith.constant 0 : index
      %c0_37 = arith.constant 0 : index
      %c0_38 = arith.constant 0 : index
      %69 = vector.load %arg5[%c0_35, %c0_36, %c0_37, %c0_38] : memref<1x1x1x4xf32, #tpu.memory_space<vmem>>, vector<1x1x1x4xf32>
      %70 = vector.shape_cast %69 : vector<1x1x1x4xf32> to vector<1x4xf32>
      %71 = vector.shape_cast %68 : vector<1x4xf32> to vector<1x1x1x4xf32>
      tpu.vector_store %arg5[%c0_35, %c0_36, %c0_37, %c0_38], %71 {strides = array<i32>} : memref<1x1x1x4xf32, #tpu.memory_space<vmem>>, vector<1x1x1x4xf32>,
    } else {
    }
    return
  }
  func.func @transform_0(%arg0: i32, %arg1: i32, %arg2: i32) -> (i32, i32, i32) {
    %c0_i32 = arith.constant 0 : i32
    return %arg0, %arg1, %arg2 : i32, i32, i32
  }
  func.func @transform_1(%arg0: i32, %arg1: i32, %arg2: i32) -> (i32, i32, i32) {
    %c0_i32 = arith.constant 0 : i32
    %c0_i32_0 = arith.constant 0 : i32
    return %arg0, %arg1, %c0_i32 : i32, i32, i32
  }
  func.func @transform_2(%arg0: i32, %arg1: i32, %arg2: i32) -> (i32, i32, i32, i32) {
    %c0_i32 = arith.constant 0 : i32
    %c0_i32_0 = arith.constant 0 : i32
    %c0_i32_1 = arith.constant 0 : i32
    return %arg0, %arg1, %c0_i32, %c0_i32_0 : i32, i32, i32, i32
  }
}

</mosaic_0001>

<bundles_post_ra>
// kernel: tpu_custom_call.1
= control target key start
LH: loop header
LB: loop body
LE: loop exit
PB: predicated region body
PF: predicated region fallthrough
CT: control target
= control target key end

     0   :  { %7 = vsyncpa [#allocation6], 0  ;;  %s2138_s0 = inlined_call_operand.hbm [shape: f32[2,64,512], index: 0, kind: input, shape index: {}]   ;;  %s2139_s1 = inlined_call_operand.vmem [shape: s32[2,64,1], index: 1, kind: input, shape index: {}]   ;;  %s2140_s2 = inlined_call_operand.hbm [shape: f32[2,1,1,4], index: 2, kind: output, shape index: {}]  }
   0x1   :  { %9 = vsyncpa [#allocation6 + $0x1], 0 }
   0x2   :  { %10 = vsyncpa [#allocation7], 0 }
   0x3   :  { %12 = vsyncpa [#allocation7 + $0x1], 0  ;;  %s1387_s9 = smov 0   ;;  %s1389_s10 = smov 0  }
   0x4   :  { %s1391_s11 = smov 0   ;;  %s1393_s12 = smov 0  }
   0x5   :  { %s1395_s13 = smov 0   ;;  %s1397_s14 = smov 0  }
   0x6 LB: > { %s1070_s15 = sadd.s32 4294967295, %s1363_s14   ;;  %s1071_s16 = sadd.s32 4294967294, %s1363_s14   ;;  %s1363_s14 = sphi %s1397_s14, %s18_s14   ;;  %s1359_s13 = sphi %s1395_s13, %s2241_s13   ;;  %s1355_s12 = sphi %s1393_s12, %s2240_s12   ;;  %s1351_s11 = sphi %s1391_s11, %s2239_s11   ;;  %s1347_s10 = sphi %s1389_s10, %s2238_s10   ;;  %s1343_s9 = sphi %s1387_s9, %s2237_s9  }
   0x7   : > { %s37_s17 = sadd.s32 1, %s1359_s13  ;;  %s48_s18 = sadd.s32 1, %s1351_s11 }
   0x8   : > { %p39_p0 = scmp.ge.s32.totalorder %s37_s17, 2  ;;  %p55_p1 = scmp.ne.s32.totalorder %s1351_s11, %s1347_s10 }
   0x9   : > { %p56_p2 = scmp.eq.s32.totalorder %s1363_s14, 0  ;;  %p61_p3 = scmp.ne.s32.totalorder %s1347_s10, %s1343_s9 }
   0xa   : > { %s2243_s17 = smov (%p39_p0, %s37_s17), 0  ;;  %p62_p5 = scmp.eq.s32.totalorder %s1070_s15, 0 }
   0xb   : > { %p1428_p4 = por %p56_p2, %p55_p1  ;;  %s41_s20 = ssub.s32 %s1359_s13, %s2243_s17 }
   0xc   : > { %p115_p6 = scmp.eq.s32.totalorder %s1070_s15, 1  ;;  %p46_p7 = scmp.eq.s32.totalorder %s41_s20, 0 }
   0xd   : > { %p1434_p8 = por %p62_p5, %p61_p3  ;;  %p121_p10 = scmp.eq.s32.totalorder %s1071_s16, 1 }
   0xe   : > { %p1438_p9 = por %p115_p6, %p55_p1  ;;  %p1098_p13 = scmp.lt.s32.totalorder %s1363_s14, 2 }
   0xf   : > { %s1443_s23 = scalar_select %p46_p7, %s1351_s11, %s48_s18  }
  0x10   : > { %s2167_s22 = scalar_select %p1438_p9, 1, 0 }
  0x11   : > { %p1445_p11 = por %p121_p10, %p61_p3  ;;  %s141_s25 = sand.u32 1, %s1351_s11  }
  0x12   : > { %s1074_s26 = sshll.u32 %s141_s25, 8  ;;  %s1084_s27 = sshll.u32 %s1359_s13, 12 }
  0x13   : > { %s2168_s24 = scalar_select %p1445_p11, 1, 0 }
  0x14   : > { %s1456_s30 = scalar_lea.hbm %s2138_s0, %s1084_s27  ;;  %s145_s3 = scalar_lea.vmem [#allocation5], %s1074_s26 }
  0x15   : > { %s157_s4 = sshll.u32 %s145_s3, 4  ;;  %p1462_p0 = pnand %p1098_p13, %p1428_p4  ;;  %s1458_s4 = int_to_ptr.vmem [resolvable:$true] %s157_s4 }
  0x16   : > { %s1467_s6 = scalar_lea.sflag [#allocation6], %s141_s25  ;;  %s1251_s7 = scalar_lea.hbm %s1456_s30, 4096 }
  0x17   : > { %p1252_p2 = scmp.ne.s32.totalorder %s1456_s30, %s1251_s7  ;;  %p1253_p3 = pneg %p1462_p0 }
  0x18   : > { %s1256_s16 = scalar_lea.hbm %s2138_s0, 8192  ;;  %p1257_p4 = scmp.lt.u32.totalorder %s1456_s30, %s2138_s0 }
  0x19   : > { %p1254_p5 = pnand %p1253_p3, %p1252_p2  ;;  %p1258_p7 = scmp.lt.u32.totalorder %s1256_s16, %s1251_s7 }
  0x1a   : > { %p1260_p13 = scmp.lt.u32.totalorder %s1251_s7, %s1456_s30 }
  0x1b   : > { %p1255_p6 = pneg %p1254_p5  ;;  %p1259_p10 = por %p1258_p7, %p1257_p4 }
  0x1d   : > { %p1261_p12 = por %p1260_p13, %p1259_p10 }
  0x1f   : > { %p1262_p1 = pnand %p1261_p12, %p1255_p6 }
  0x21   : > { %1265 = shalt.err (!%p1262_p1)
}
  0x22   : > { %s1266_s20 = scalar_lea.vmem %s1458_s4, 4096  ;;  %s1365_s25 = smov [#allocation5]  }
  0x23   : > { %p1267_p2 = scmp.ne.s32.totalorder %s1458_s4, %s1266_s20  ;;  %s1271_s26 = sshll.u32 %s1365_s25, 4  ;;  %s1272_s26 = int_to_ptr.vmem [resolvable:$false] %s1271_s26 }
  0x24   : > { %s1273_s27 = scalar_lea.vmem %s1272_s26, 8192  ;;  %p1274_p9 = scmp.lt.s32.totalorder %s1458_s4, %s1272_s26 }
  0x25   : > { %p1269_p5 = pnand %p1267_p2, %p1253_p3  ;;  %p1275_p4 = scmp.lt.s32.totalorder %s1273_s27, %s1266_s20 }
  0x27   : > { %p1270_p11 = pneg %p1269_p5  ;;  %p1276_p7 = por %p1275_p4, %p1274_p9 }
  0x29   : > { %p1277_p10 = pnand %p1276_p7, %p1270_p11 }
  0x2b   : > { %1280 = shalt.err (!%p1277_p10)
}
  0x2c   : > { %s1366_s28 = smov 512   ;;  %s1367_s29 = smov 32  }
  0x2d   : > { %1093 = dma.hbm_to_vmem [thread:$0]  (!%p1462_p0), %s1456_s30, 4096, %s1458_s4, %s1467_s6, %s1366_s28, %s1366_s28, %s1367_s29  }
  0x2e   : > { %p178_p12 = scmp.lt.s32.totalorder %s1363_s14, 3  ;;  %p2170_p1 = scmp.ge.s32.totalorder %s1363_s14, 1 }
  0x30   : > { %p179_p3 = pnand %p2170_p1, %p178_p12 }
  0x32   : > { %182 = sbr.rel (%p179_p3) target bundleno = 723 (0x2d3), region = 28 }
  0x39   : > { %s1499_s3 = sand.u32 1, %s1347_s10  }
  0x3a   : > { %s1078_s7 = sshll.u32 %s1499_s3, 8  ;;  %s185_s8 = scalar_lea.sflag [#allocation6], %s1499_s3 }
  0x3b   : > { %s1503_s15 = scalar_lea.vmem [#allocation5], %s1078_s7 }
  0x3c   : > { %1334 = dma.done.wait (%p1434_p8), %s185_s8, 4096  }
  0x3d   : > { %1336 = vsyncadd (%p1434_p8), %s185_s8, 4294963200  ;;  %vm233_vm0 = vcmask 7168   ;;  %v1368_v0 = vmov -1e+30   ;;  %v1518_v1 = vld [vmem:[%s1503_s15] sm:$0xff]  ;;  %v1521_v2 = vld [vmem:[%s1503_s15 + $0x8] sm:$0xff] }
  0x3e   : > { %234 = vst.msk [vmem:[#allocation2] sm:$0xff] %vm233_vm0, %v1368_v0  ;;  %235 = vst.msk [vmem:[#allocation2 + $0x8] sm:$0xff] %vm233_vm0, %v1368_v0  ;;  %v1524_v3 = vld [vmem:[%s1503_s15 + $0x10] sm:$0xff]  ;;  %v466_v4 = vmax.f32 %v1518_v1, %v1521_v2  ;;  %v1529_v5 = vld [vmem:[%s1503_s15 + $0x20] sm:$0xff]  ;;  %v1369_v57 = vmov 0   ;;  %v1370_v58 = vmov 0.0  }
  0x3f   : > { %236 = vst.msk [vmem:[#allocation2 + $0x10] sm:$0xff] %vm233_vm0, %v1368_v0  ;;  %237 = vst.msk [vmem:[#allocation2 + $0x18] sm:$0xff] %vm233_vm0, %v1368_v0  ;;  %v1532_v6 = vld [vmem:[%s1503_s15 + $0x28] sm:$0xff]  ;;  %v1535_v7 = vld [vmem:[%s1503_s15 + $0x18] sm:$0xff]  ;;  %1153 = vset.pattern.permute.xlu0 %v1369_v57  ;;  %1154 = vset.pattern.permute.xlu1 %v1369_v57  ;;  %p220_p8 = scmp.lt.s32.totalorder %s1355_s12, 1  ;;  %s1081_s16 = sshll.u32 %s1355_s12, 4 }
  0x40   : > { %238 = vst.msk [vmem:[#allocation2 + $0x20] sm:$0xff] %vm233_vm0, %v1368_v0  ;;  %239 = vst.msk [vmem:[#allocation2 + $0x28] sm:$0xff] %vm233_vm0, %v1368_v0  ;;  %v1538_v8 = vld [vmem:[%s1503_s15 + $0x30] sm:$0xff]  ;;  %v471_v9 = vmax.f32 %v1529_v5, %v1532_v6  ;;  %v1543_v10 = vld [vmem:[%s1503_s15 + $0x40] sm:$0xff]  ;;  %v467_v11 = vmax.f32 %v466_v4, %v1524_v3  ;;  %s216_s18 = scalar_lea.vmem [#allocation8], %s1499_s3  ;;  %s2089_s26 = scalar_lea.hbm %s2140_s2, %s1081_s16 }
  0x41   : > { %240 = vst.msk [vmem:[#allocation2 + $0x30] sm:$0xff] %vm233_vm0, %v1368_v0  ;;  %241 = vst.msk [vmem:[#allocation2 + $0x38] sm:$0xff] %vm233_vm0, %v1368_v0  ;;  %v1547_v12 = vld [vmem:[%s1503_s15 + $0x38] sm:$0xff]  ;;  %v1550_v13 = vld [vmem:[%s1503_s15 + $0x48] sm:$0xff]  ;;  %s221_s21 = scalar_select %p220_p8, %s1355_s12, 1 }
  0x42   : > { %v1553_v14 = vld [vmem:[%s1503_s15 + $0x50] sm:$0xff]  ;;  %v472_v15 = vmax.f32 %v471_v9, %v1538_v8  ;;  %v476_v16 = vmax.f32 %v1543_v10, %v1550_v13  ;;  %v1559_v17 = vld [vmem:[%s1503_s15 + $0x60] sm:$0xff]  ;;  %v1562_v18 = vld [vmem:[%s1503_s15 + $0x68] sm:$0xff]  ;;  %v468_v20 = vmax.f32 %v467_v11, %v1535_v7  ;;  %242 = vst.msk [vmem:[#allocation3] sm:$0xff] %vm233_vm0, %v1370_v58  ;;  %s969_s19 = sshll.u32 %s216_s18, 4  ;;  %s956_s27 = scalar_lea.sflag [#allocation7], %s1499_s3  ;;  %s2091_s19 = int_to_ptr.vmem [resolvable:$true] %s969_s19 }
  0x43   : > { %v1565_v19 = vld [vmem:[%s1503_s15 + $0x70] sm:$0xff]  ;;  %v1569_v21 = vld [vmem:[%s1503_s15 + $0x58] sm:$0xff]  ;;  %v481_v22 = vmax.f32 %v1559_v17, %v1562_v18  ;;  %v1574_v23 = vld [vmem:[%s1503_s15 + $0x80] sm:$0xff]  ;;  %243 = vst.msk [vmem:[#allocation3 + $0x8] sm:$0xff] %vm233_vm0, %v1370_v58  ;;  %s1085_s30 = sshll.u32 %s221_s21, 6  ;;  %s1281_s28 = scalar_lea.vmem %s2091_s19, 16 }
  0x44   : > { %v1577_v24 = vld [vmem:[%s1503_s15 + $0x88] sm:$0xff]  ;;  %v477_v25 = vmax.f32 %v476_v16, %v1553_v14  ;;  %v1581_v26 = vld [vmem:[%s1503_s15 + $0x78] sm:$0xff]  ;;  %v1584_v27 = vld [vmem:[%s1503_s15 + $0x90] sm:$0xff]  ;;  %469 = vmax.xlane.f32.xlu0 %v468_v20  ;;  %v473_v30 = vmax.f32 %v472_v15, %v1547_v12  ;;  %244 = vst.msk [vmem:[#allocation3 + $0x10] sm:$0xff] %vm233_vm0, %v1370_v58  ;;  %s1671_s6 = scalar_lea.vmem %s2139_s1, %s1085_s30  ;;  %p1282_p9 = scmp.ne.s32.totalorder %s2091_s19, %s1281_s28 }
  0x45   : > { %v486_v28 = vmax.f32 %v1574_v23, %v1577_v24  ;;  %v1589_v29 = vld [vmem:[%s1503_s15 + $0xa0] sm:$0xff]  ;;  %v482_v31 = vmax.f32 %v481_v22, %v1565_v19  ;;  %v1594_v32 = vld [vmem:[%s1503_s15 + $0x98] sm:$0xff]  ;;  %v1597_v33 = vld [vmem:[%s1503_s15 + $0xa8] sm:$0xff]  ;;  %245 = vst.msk [vmem:[#allocation3 + $0x18] sm:$0xff] %vm233_vm0, %v1370_v58  ;;  %p2234_p11 = scmp.ne.s32.totalorder %s2167_s22, 0  ;;  %s1371_s12 = smov [#allocation8]  }
  0x46   : > { %v1600_v34 = vld [vmem:[%s1503_s15 + $0xb0] sm:$0xff]  ;;  %v478_v35 = vmax.f32 %v477_v25, %v1569_v21  ;;  %v491_v37 = vmax.f32 %v1589_v29, %v1597_v33  ;;  %v1607_v38 = vld [vmem:[%s1503_s15 + $0xc0] sm:$0xff]  ;;  %v1610_v39 = vld [vmem:[%s1503_s15 + $0xc8] sm:$0xff]  ;;  %246 = vst.msk [vmem:[#allocation3 + $0x20] sm:$0xff] %vm233_vm0, %v1370_v58  ;;  %s1285_s29 = sshll.u32 %s1371_s12, 4  ;;  %s1286_s29 = int_to_ptr.vmem [resolvable:$false] %s1285_s29 }
  0x47   : > { %v487_v36 = vmax.f32 %v486_v28, %v1584_v27  ;;  %v1613_v40 = vld [vmem:[%s1503_s15 + $0xd0] sm:$0xff]  ;;  %v496_v41 = vmax.f32 %v1607_v38, %v1610_v39  ;;  %v1618_v42 = vld [vmem:[%s1503_s15 + $0xe0] sm:$0xff]  ;;  %v1621_v43 = vld [vmem:[%s1503_s15 + $0xe8] sm:$0xff]  ;;  %v483_v44 = vmax.f32 %v482_v31, %v1581_v26  ;;  %247 = vst.msk [vmem:[#allocation3 + $0x28] sm:$0xff] %vm233_vm0, %v1370_v58  ;;  %p1283_p0 = pnand %p1282_p9, %p2234_p11  ;;  %s1287_s7 = scalar_lea.vmem %s1286_s29, 32 }
  0x48   : > { %479 = vmax.xlane.f32.xlu1 %v478_v35  ;;  %v492_v45 = vmax.f32 %v491_v37, %v1600_v34  ;;  %v501_v46 = vmax.f32 %v1618_v42, %v1621_v43  ;;  %474 = vmax.xlane.f32.xlu0 %v473_v30  ;;  %v1629_v48 = vld [vmem:[%s1503_s15 + $0xb8] sm:$0xff]  ;;  %v1633_v50 = vld [vmem:[%s1503_s15 + $0xf0] sm:$0xff]  ;;  %248 = vst.msk [vmem:[#allocation3 + $0x30] sm:$0xff] %vm233_vm0, %v1370_v58  ;;  %249 = vst.msk [vmem:[#allocation3 + $0x38] sm:$0xff] %vm233_vm0, %v1370_v58  ;;  %p1288_p13 = scmp.lt.s32.totalorder %s2091_s19, %s1286_s29  ;;  %p1289_p2 = scmp.lt.s32.totalorder %s1287_s7, %s1281_s28 }
  0x49   : > { %v488_v47 = vmax.f32 %v487_v36, %v1594_v32  ;;  %v497_v49 = vmax.f32 %v496_v41, %v1613_v40  ;;  %v1636_v51 = vld [vmem:[%s1503_s15 + $0xd8] sm:$0xff]  ;;  %250 = vst.msk [vmem:[#allocation4] sm:$0xff] %vm233_vm0, %v1370_v58  ;;  %251 = vst.msk [vmem:[#allocation4 + $0x8] sm:$0xff] %vm233_vm0, %v1370_v58  ;;  %v1663_v59 = vld [vmem:[#allocation2] sm:$0xff]  ;;  %p1284_p6 = pneg %p1283_p0 }
  0x4a   : > { %v493_v52 = vmax.f32 %v492_v45, %v1629_v48  ;;  %v502_v53 = vmax.f32 %v501_v46, %v1633_v50  ;;  %v1642_v55 = vld [vmem:[%s1503_s15 + $0xf8] sm:$0xff]  ;;  %252 = vst.msk [vmem:[#allocation4 + $0x10] sm:$0xff] %vm233_vm0, %v1370_v58  ;;  %253 = vst.msk [vmem:[#allocation4 + $0x18] sm:$0xff] %vm233_vm0, %v1370_v58  ;;  %v1673_v62 = vld [vmem:[#allocation2 + $0x10] sm:$0xff]  ;;  %p1290_p5 = por %p1289_p2, %p1288_p13 }
  0x4b   : > { %v498_v54 = vmax.f32 %v497_v49, %v1636_v51  ;;  %254 = vst.msk [vmem:[#allocation4 + $0x20] sm:$0xff] %vm233_vm0, %v1370_v58  ;;  %255 = vst.msk [vmem:[#allocation4 + $0x28] sm:$0xff] %vm233_vm0, %v1370_v58  ;;  %v1675_v63 = vld [vmem:[#allocation2 + $0x8] sm:$0xff]  ;;  %v1691_v20 = vld [vmem:[#allocation2 + $0x18] sm:$0xff] }
  0x4c   : > { %484 = vmax.xlane.f32.xlu1 %v483_v44  ;;  %489 = vmax.xlane.f32.xlu0 %v488_v47  ;;  %v503_v56 = vmax.f32 %v502_v53, %v1642_v55  ;;  %256 = vst.msk [vmem:[#allocation4 + $0x30] sm:$0xff] %vm233_vm0, %v1370_v58  ;;  %257 = vst.msk [vmem:[#allocation4 + $0x38] sm:$0xff] %vm233_vm0, %v1370_v58  ;;  %v1683_v11 = vld [vmem:[%s1671_s6 + $0x8] sm:$0xff]  ;;  %v1697_v25 = vld [vmem:[#allocation2 + $0x20] sm:$0xff]  ;;  %p1291_p4 = pnand %p1290_p5, %p1284_p6 }
  0x4d   : > { %2171 = vst [vmem:[#allocation11_spill] sm:$0xff] %v1673_v62  ;;  %2172 = vst [vmem:[#allocation12_spill] sm:$0xff] %v1675_v63  ;;  %v1706_v31 = vld [vmem:[%s1671_s6 + $0x18] sm:$0xff]  ;;  %v1714_v41 = vld [vmem:[#allocation2 + $0x28] sm:$0xff] }
  0x4e   : > { %2173 = vst [vmem:[#allocation13_spill] sm:$0xff] %v1683_v11  ;;  %2176 = vst [vmem:[#allocation16_spill] sm:$0xff] %v1691_v20  ;;  %v1720_v45 = vld [vmem:[#allocation2 + $0x30] sm:$0xff]  ;;  %v1729_v49 = vld [vmem:[%s1671_s6 + $0x28] sm:$0xff] }
  0x4f   : > { %2177 = vst [vmem:[#allocation17_spill] sm:$0xff] %v1697_v25  ;;  %2178 = vst [vmem:[#allocation18_spill] sm:$0xff] %v1706_v31 }
  0x50   : > { %494 = vmax.xlane.f32.xlu1 %v493_v52  ;;  %499 = vmax.xlane.f32.xlu0 %v498_v54  ;;  %2181 = vst [vmem:[#allocation21_spill] sm:$0xff] %v1714_v41  ;;  %2182 = vst [vmem:[#allocation22_spill] sm:$0xff] %v1720_v45 }
  0x51   : > { %2183 = vst [vmem:[#allocation23_spill] sm:$0xff] %v1729_v49 }
  0x54   : > { %504 = vmax.xlane.f32.xlu1 %v503_v56  ;;  %v1737_v56 = vld [vmem:[#allocation2 + $0x38] sm:$0xff] }
  0x55   : > { %2186 = vst [vmem:[#allocation26_spill] sm:$0xff] %v1737_v56 }
  0xd1   : > { %v470_v60 = vpop.xlane.xlu0 %469 }
  0xd2   : > { %v1666_v61 = vmax.f32 %v1663_v59, %v470_v60 }
  0xd4   : > { %754 = vst.msk [vmem:[#allocation2] sm:$0xff] %vm233_vm0, %v1666_v61  ;;  %564 = vperm.xlu0 %1153, %v1666_v61  }
  0xd5   : > { %v480_v4 = vpop.xlane.xlu1 %479  ;;  %v475_v9 = vpop.xlane.xlu0 %474 }
  0xd6   : > { %v1686_v15 = vmax.f32 %v1673_v62, %v480_v4  ;;  %v1689_v16 = vmax.f32 %v1675_v63, %v475_v9  ;;  %v1750_v4 = vld [vmem:[%s1671_s6 + $0x38] sm:$0xff] }
  0xd7   : > { %2187 = vst [vmem:[#allocation27_spill] sm:$0xff] %v1750_v4 }
  0xd8   : > { %2174 = vst [vmem:[#allocation14_spill] sm:$0xff] %v1686_v15  ;;  %2175 = vst [vmem:[#allocation15_spill] sm:$0xff] %v1689_v16  ;;  %569 = vperm.xlu1 %1154, %v1689_v16   ;;  %325 = vperm.xlu0 %1153, %v1683_v11  }
  0xd9   : > { %756 = vst.msk [vmem:[#allocation2 + $0x10] sm:$0xff] %vm233_vm0, %v1686_v15  ;;  %755 = vst.msk [vmem:[#allocation2 + $0x8] sm:$0xff] %vm233_vm0, %v1689_v16  ;;  %v485_v30 = vpop.xlane.xlu1 %484  ;;  %v490_v36 = vpop.xlane.xlu0 %489 }
  0xda   : > { %v1709_v35 = vmax.f32 %v1691_v20, %v485_v30  ;;  %v1712_v37 = vmax.f32 %v1697_v25, %v490_v36  ;;  %v1765_v36 = vld [vmem:[%s1671_s6] sm:$0xff] }
  0xdb   : > { %2189 = vst [vmem:[#allocation29_spill] sm:$0xff] %v1765_v36 }
  0xdc   : > { %2179 = vst [vmem:[#allocation19_spill] sm:$0xff] %v1709_v35  ;;  %2180 = vst [vmem:[#allocation20_spill] sm:$0xff] %v1712_v37  ;;  %574 = vperm.xlu1 %1154, %v1686_v15   ;;  %331 = vperm.xlu0 %1153, %v1706_v31  }
  0xdd   : > { %757 = vst.msk [vmem:[#allocation2 + $0x18] sm:$0xff] %vm233_vm0, %v1709_v35  ;;  %758 = vst.msk [vmem:[#allocation2 + $0x20] sm:$0xff] %vm233_vm0, %v1712_v37  ;;  %v495_v47 = vpop.xlane.xlu1 %494  ;;  %v500_v53 = vpop.xlane.xlu0 %499 }
  0xde   : > { %v1732_v52 = vmax.f32 %v1714_v41, %v495_v47  ;;  %v1735_v54 = vmax.f32 %v1720_v45, %v500_v53  ;;  %v1769_v47 = vld [vmem:[%s1671_s6 + $0x10] sm:$0xff]  ;;  %v1773_v53 = vld [vmem:[%s1671_s6 + $0x20] sm:$0xff] }
  0xdf   : > { %2190 = vst [vmem:[#allocation30_spill] sm:$0xff] %v1769_v47  ;;  %2191 = vst [vmem:[#allocation31_spill] sm:$0xff] %v1773_v53 }
  0xe0   : > { %2184 = vst [vmem:[#allocation24_spill] sm:$0xff] %v1732_v52  ;;  %2185 = vst [vmem:[#allocation25_spill] sm:$0xff] %v1735_v54  ;;  %579 = vperm.xlu1 %1154, %v1709_v35   ;;  %337 = vperm.xlu0 %1153, %v1729_v49  }
  0xe1   : > { %759 = vst.msk [vmem:[#allocation2 + $0x28] sm:$0xff] %vm233_vm0, %v1732_v52  ;;  %760 = vst.msk [vmem:[#allocation2 + $0x30] sm:$0xff] %vm233_vm0, %v1735_v54  ;;  %v505_v60 = vpop.xlane.xlu1 %504 }
  0xe2   : > { %v1753_v9 = vmax.f32 %v1737_v56, %v505_v60  ;;  %v1777_v60 = vld [vmem:[%s1671_s6 + $0x30] sm:$0xff] }
  0xe3   : > { %2192 = vst [vmem:[#allocation32_spill] sm:$0xff] %v1777_v60 }
  0xe4   : > { %2188 = vst [vmem:[#allocation28_spill] sm:$0xff] %v1753_v9  ;;  %761 = vst.msk [vmem:[#allocation2 + $0x38] sm:$0xff] %vm233_vm0, %v1753_v9  ;;  %584 = vperm.xlu1 %1154, %v1712_v37   ;;  %343 = vperm.xlu0 %1153, %v1750_v4  }
  0xe8   : > { %589 = vperm.xlu1 %1154, %v1732_v52  }
  0xec   : > { %594 = vperm.xlu1 %1154, %v1735_v54  }
  0xf0   : > { %599 = vperm.xlu1 %1154, %v1753_v9  }
  0xf4   : > { %322 = vperm.xlu1 %1154, %v1765_v36  }
  0xf8   : > { %328 = vperm.xlu1 %1154, %v1769_v47  }
  0xfc   : > { %334 = vperm.xlu1 %1154, %v1773_v53  }
 0x100   : > { %340 = vperm.xlu1 %1154, %v1777_v60  }
 0x153   : > { %v565_v30 = vpop.permute.xlu0 %564 }
 0x154   : > { %v602_v58 = vsub.f32 %v1518_v1, %v565_v30  ;;  %v603_v57 = vsub.f32 %v1521_v2, %v565_v30  ;;  %v604_v46 = vsub.f32 %v1524_v3, %v565_v30  ;;  %v605_v44 = vsub.f32 %v1535_v7, %v565_v30 }
 0x156   : > { %v634_v22 = vmul.f32 1.442695, %v602_v58  ;;  %v636_v28 = vmul.f32 1.442695, %v603_v57  ;;  %v638_v0 = vmul.f32 1.442695, %v604_v46 }
 0x157   : > { %v640_v4 = vmul.f32 1.442695, %v605_v44  ;;  %v570_v49 = vpop.permute.xlu1 %569 }
 0x158   : > { %1155 = vpow2.f32 %v634_v22  ;;  %v606_v53 = vsub.f32 %v1529_v5, %v570_v49  ;;  %v607_v31 = vsub.f32 %v1532_v6, %v570_v49  ;;  %v608_v60 = vsub.f32 %v1538_v8, %v570_v49 }
 0x159   : > { %1157 = vpow2.f32 %v636_v28  ;;  %v609_v47 = vsub.f32 %v1547_v12, %v570_v49 }
 0x15a   : > { %1159 = vpow2.f32 %v638_v0  ;;  %v642_v11 = vmul.f32 1.442695, %v606_v53  ;;  %v644_v36 = vmul.f32 1.442695, %v607_v31  ;;  %v646_v9 = vmul.f32 1.442695, %v608_v60 }
 0x15b   : > { %1161 = vpow2.f32 %v640_v4  ;;  %v648_v58 = vmul.f32 1.442695, %v609_v47  ;;  %v575_v57 = vpop.permute.xlu1 %574 }
 0x15c   : > { %1163 = vpow2.f32 %v642_v11  ;;  %v610_v44 = vsub.f32 %v1543_v10, %v575_v57  ;;  %v611_v22 = vsub.f32 %v1550_v13, %v575_v57  ;;  %v612_v46 = vsub.f32 %v1553_v14, %v575_v57 }
 0x15d   : > { %1165 = vpow2.f32 %v644_v36  ;;  %v613_v30 = vsub.f32 %v1569_v21, %v575_v57 }
 0x15e   : > { %1167 = vpow2.f32 %v646_v9  ;;  %v650_v28 = vmul.f32 1.442695, %v610_v44  ;;  %v652_v49 = vmul.f32 1.442695, %v611_v22  ;;  %v654_v0 = vmul.f32 1.442695, %v612_v46 }
 0x15f   : > { %1169 = vpow2.f32 %v648_v58  ;;  %v656_v31 = vmul.f32 1.442695, %v613_v30  ;;  %v580_v53 = vpop.permute.xlu1 %579  ;;  %v2158_v46 = vlaneseq }
 0x160   : > { %1171 = vpow2.f32 %v650_v28  ;;  %v614_v4 = vsub.f32 %v1559_v17, %v580_v53  ;;  %v615_v11 = vsub.f32 %v1562_v18, %v580_v53  ;;  %v616_v47 = vsub.f32 %v1565_v19, %v580_v53 }
 0x161   : > { %1173 = vpow2.f32 %v652_v49  ;;  %v617_v60 = vsub.f32 %v1581_v26, %v580_v53 }
 0x162   : > { %v1156_v36 = vpop.eup %1155  ;;  %1175 = vpow2.f32 %v654_v0  ;;  %v658_v57 = vmul.f32 1.442695, %v614_v4  ;;  %v660_v9 = vmul.f32 1.442695, %v615_v11  ;;  %v662_v44 = vmul.f32 1.442695, %v616_v47 }
 0x163   : > { %v1158_v22 = vpop.eup %1157  ;;  %1177 = vpow2.f32 %v656_v31  ;;  %v664_v58 = vmul.f32 1.442695, %v617_v60  ;;  %v585_v30 = vpop.permute.xlu1 %584  ;;  %v1801_v60 = vand.u32 127, %v2158_v46 }
 0x164   : > { %v1160_v28 = vpop.eup %1159  ;;  %1179 = vpow2.f32 %v658_v57  ;;  %v618_v56 = vsub.f32 %v1574_v23, %v585_v30  ;;  %v619_v54 = vsub.f32 %v1577_v24, %v585_v30  ;;  %v620_v49 = vsub.f32 %v1584_v27, %v585_v30 }
 0x165   : > { %v1162_v45 = vpop.eup %1161  ;;  %1181 = vpow2.f32 %v660_v9  ;;  %v621_v0 = vsub.f32 %v1594_v32, %v585_v30  ;;  %v698_v41 = vadd.f32 %v1158_v22, %v1156_v36 }
 0x166   : > { %v1164_v53 = vpop.eup %1163  ;;  %1183 = vpow2.f32 %v662_v44  ;;  %v666_v4 = vmul.f32 1.442695, %v618_v56  ;;  %v668_v11 = vmul.f32 1.442695, %v619_v54  ;;  %v670_v47 = vmul.f32 1.442695, %v620_v49  ;;  %v1806_v56 = vpop.permute.xlu0 %325 }
 0x167   : > { %v1166_v31 = vpop.eup %1165  ;;  %1185 = vpow2.f32 %v664_v58  ;;  %v672_v57 = vmul.f32 1.442695, %v621_v0  ;;  %v590_v52 = vpop.permute.xlu1 %589  ;;  %v699_v49 = vadd.f32 %v1160_v28, %v698_v41  ;;  %vm349_vm3 = vcmp.eq.s32.totalorder %v1801_v60, %v1806_v56 }
 0x168   : > { %v1168_v37 = vpop.eup %1167  ;;  %1187 = vpow2.f32 %v666_v4  ;;  %v622_v25 = vsub.f32 %v1589_v29, %v590_v52  ;;  %v623_v9 = vsub.f32 %v1597_v33, %v590_v52  ;;  %v624_v30 = vsub.f32 %v1600_v34, %v590_v52 }
 0x169   : > { %v1170_v44 = vpop.eup %1169  ;;  %1189 = vpow2.f32 %v668_v11  ;;  %v625_v54 = vsub.f32 %v1629_v48, %v590_v52  ;;  %v703_v46 = vadd.f32 %v1166_v31, %v1164_v53  ;;  %v700_v20 = vadd.f32 %v1162_v45, %v699_v49 }
 0x16a   : > { %v1172_v58 = vpop.eup %1171  ;;  %1191 = vpow2.f32 %v670_v47  ;;  %v674_v0 = vmul.f32 1.442695, %v622_v25  ;;  %v676_v36 = vmul.f32 1.442695, %v623_v9  ;;  %v678_v22 = vmul.f32 1.442695, %v624_v30  ;;  %v1816_v9 = vpop.permute.xlu0 %331 }
 0x16b   : > { %v1174_v4 = vpop.eup %1173  ;;  %1193 = vpow2.f32 %v672_v57  ;;  %v680_v35 = vmul.f32 1.442695, %v625_v54  ;;  %v595_v15 = vpop.permute.xlu1 %594  ;;  %v704_v62 = vadd.f32 %v1168_v37, %v703_v46  ;;  %701 = vadd.xlane.f32.xlu1 %v700_v20  ;;  %v1814_v57 = vadd.s32 128, %v1801_v60 }
 0x16c   : > { %v1176_v16 = vpop.eup %1175  ;;  %1195 = vpow2.f32 %v674_v0  ;;  %v626_v63 = vsub.f32 %v1607_v38, %v595_v15  ;;  %v627_v11 = vsub.f32 %v1610_v39, %v595_v15  ;;  %v628_v41 = vsub.f32 %v1613_v40, %v595_v15 }
 0x16d   : > { %v1178_v52 = vpop.eup %1177  ;;  %1197 = vpow2.f32 %v676_v36  ;;  %v629_v25 = vsub.f32 %v1636_v51, %v595_v15  ;;  %v705_v28 = vadd.f32 %v1170_v44, %v704_v62  ;;  %v708_v53 = vadd.f32 %v1174_v4, %v1172_v58 }
 0x16e   : > { %v1180_v47 = vpop.eup %1179  ;;  %1199 = vpow2.f32 %v678_v22  ;;  %v682_v45 = vmul.f32 1.442695, %v626_v63  ;;  %v684_v31 = vmul.f32 1.442695, %v627_v11  ;;  %v686_v37 = vmul.f32 1.442695, %v628_v41 }
 0x16f   : > { %v1182_v46 = vpop.eup %1181  ;;  %1201 = vpow2.f32 %v680_v35  ;;  %v688_v30 = vmul.f32 1.442695, %v629_v25  ;;  %706 = vadd.xlane.f32.xlu0 %v705_v28  ;;  %v600_v54 = vpop.permute.xlu1 %599  ;;  %v709_v20 = vadd.f32 %v1176_v16, %v708_v53  ;;  %v1823_v16 = vadd.s32 256, %v1801_v60 }
 0x170   : > { %v1184_v49 = vpop.eup %1183  ;;  %1203 = vpow2.f32 %v682_v45  ;;  %v630_v62 = vsub.f32 %v1618_v42, %v600_v54  ;;  %v631_v15 = vsub.f32 %v1621_v43, %v600_v54  ;;  %v632_v63 = vsub.f32 %v1633_v50, %v600_v54 }
 0x171   : > { %v1186_v44 = vpop.eup %1185  ;;  %1205 = vpow2.f32 %v684_v31  ;;  %v633_v58 = vsub.f32 %v1642_v55, %v600_v54  ;;  %v710_v0 = vadd.f32 %v1178_v52, %v709_v20  ;;  %v713_v36 = vadd.f32 %v1182_v46, %v1180_v47  ;;  %v1834_v31 = vpop.permute.xlu0 %337 }
 0x172   : > { %v1188_v22 = vpop.eup %1187  ;;  %1207 = vpow2.f32 %v686_v37  ;;  %v690_v35 = vmul.f32 1.442695, %v630_v62  ;;  %v692_v4 = vmul.f32 1.442695, %v631_v15  ;;  %v694_v41 = vmul.f32 1.442695, %v632_v63 }
 0x173   : > { %v1190_v11 = vpop.eup %1189  ;;  %1209 = vpow2.f32 %v688_v30  ;;  %711 = vadd.xlane.f32.xlu0 %v710_v0  ;;  %v1825_v25 = vpop.permute.xlu1 %322  ;;  %v714_v28 = vadd.f32 %v1184_v49, %v713_v36  ;;  %v1828_v53 = vadd.s32 384, %v1801_v60  ;;  %v696_v37 = vmul.f32 1.442695, %v633_v58 }
 0x174   : > { %v1192_v45 = vpop.eup %1191  ;;  %1211 = vpow2.f32 %v690_v35  ;;  %vm345_vm1 = vcmp.eq.s32.totalorder %v1801_v60, %v1825_v25  ;;  %vm346_vm2 = vcmp.eq.s32.totalorder %v1814_v57, %v1825_v25  ;;  %v718_v52 = vadd.f32 %v1190_v11, %v1188_v22 }
 0x175   : > { %v1194_v47 = vpop.eup %1193  ;;  %1213 = vpow2.f32 %v692_v4  ;;  %v715_v46 = vadd.f32 %v1186_v44, %v714_v28  ;;  %vm350_vm4 = vcmp.eq.s32.totalorder %v1814_v57, %v1806_v56  ;;  %vm351_vm5 = vcmp.eq.s32.totalorder %v1823_v16, %v1806_v56 }
 0x176   : > { %v1196_v30 = vpop.eup %1195  ;;  %v719_v54 = vadd.f32 %v1192_v45, %v718_v52  ;;  %1215 = vpow2.f32 %v694_v41  ;;  %v377_v62 = vsel %vm345_vm1, %v1518_v1, 0.0  ;;  %v378_v15 = vsel %vm346_vm2, %v1521_v2, 0.0 }
 0x177   : > { %v1198_v20 = vpop.eup %1197  ;;  %716 = vadd.xlane.f32.xlu1 %v715_v46  ;;  %v1842_v49 = vpop.permute.xlu1 %328  ;;  %vm352_vm6 = vcmp.eq.s32.totalorder %v1828_v53, %v1806_v56  ;;  %vm357_vm9 = vcmp.eq.s32.totalorder %v1801_v60, %v1816_v9  ;;  %vm358_vm10 = vcmp.eq.s32.totalorder %v1814_v57, %v1816_v9  ;;  %1217 = vpow2.f32 %v696_v37 }
 0x178   : > { %v1200_v63 = vpop.eup %1199  ;;  %vm353_vm7 = vcmp.eq.s32.totalorder %v1801_v60, %v1842_v49  ;;  %vm354_vm8 = vcmp.eq.s32.totalorder %v1814_v57, %v1842_v49  ;;  %v720_v44 = vadd.f32 %v1194_v47, %v719_v54  ;;  %v723_v58 = vadd.f32 %v1198_v20, %v1196_v30 }
 0x179   : > { %v1202_v0 = vpop.eup %1201  ;;  %v381_v1 = vsel %vm349_vm3, %v1529_v5, 0.0  ;;  %vm347_vm11 = vcmp.eq.s32.totalorder %v1823_v16, %v1825_v25  ;;  %v409_v22 = vadd.f32 %v378_v15, %v377_v62  ;;  %v382_v35 = vsel %vm350_vm4, %v1532_v6, 0.0  ;;  %v1876_v5 = vpop.permute.xlu0 %343 }
 0x17a   : > { %v1204_v2 = vpop.eup %1203  ;;  %721 = vadd.xlane.f32.xlu0 %v720_v44  ;;  %v724_v36 = vadd.f32 %v1200_v63, %v723_v58  ;;  %vm365_vm12 = vcmp.eq.s32.totalorder %v1801_v60, %v1834_v31  ;;  %vm366_vm13 = vcmp.eq.s32.totalorder %v1814_v57, %v1834_v31  ;;  %v385_v41 = vsel %vm353_vm7, %v1543_v10, 0.0 }
 0x17b   : > { %v1206_v4 = vpop.eup %1205  ;;  %v1878_v11 = vpop.permute.xlu1 %334  ;;  %v386_v6 = vsel %vm354_vm8, %v1550_v13, 0.0  ;;  %v379_v10 = vsel %vm347_vm11, %v1524_v3, 0.0  ;;  %v383_v13 = vsel %vm351_vm5, %v1538_v8, 0.0  ;;  %v384_v37 = vsel %vm352_vm6, %v1547_v12, 0.0 }
 0x17c   : > { %v1208_v28 = vpop.eup %1207  ;;  %vm361_vm14 = vcmp.eq.s32.totalorder %v1801_v60, %v1878_v11  ;;  %vm362_vm15 = vcmp.eq.s32.totalorder %v1814_v57, %v1878_v11  ;;  %v725_v45 = vadd.f32 %v1202_v0, %v724_v36  ;;  %v728_v52 = vadd.f32 %v1206_v4, %v1204_v2 }
 0x17d   : > { %v1210_v47 = vpop.eup %1209  ;;  %v414_v46 = vadd.f32 %v382_v35, %v381_v1  ;;  %vm373_vm1 = vcmp.eq.s32.totalorder %v1801_v60, %v1876_v5  ;;  %vm374_vm2 = vcmp.eq.s32.totalorder %v1814_v57, %v1876_v5  ;;  %vm348_vm3 = vcmp.eq.s32.totalorder %v1828_v53, %v1825_v25 }
 0x17e   : > { %v1212_v30 = vpop.eup %1211  ;;  %726 = vadd.xlane.f32.xlu1 %v725_v45  ;;  %v729_v3 = vadd.f32 %v1208_v28, %v728_v52  ;;  %v410_v54 = vadd.f32 %v409_v22, %v379_v10  ;;  %vm355_vm4 = vcmp.eq.s32.totalorder %v1823_v16, %v1842_v49  ;;  %v419_v12 = vadd.f32 %v386_v6, %v385_v41 }
 0x17f   : > { %v1214_v8 = vpop.eup %1213  ;;  %v1910_v20 = vpop.permute.xlu1 %340  ;;  %v393_v56 = vsel %vm361_vm14, %v1574_v23, 0.0  ;;  %v394_v62 = vsel %vm362_vm15, %v1577_v24, 0.0  ;;  %v389_v63 = vsel %vm357_vm9, %v1559_v17, 0.0  ;;  %v390_v44 = vsel %vm358_vm10, %v1562_v18, 0.0 }
 0x180   : > { %v730_v15 = vadd.f32 %v1210_v47, %v729_v3  ;;  %v733_v25 = vadd.f32 %v1214_v8, %v1212_v30  ;;  %v1216_v58 = vpop.eup %1215  ;;  %v380_v23 = vsel %vm348_vm3, %v1535_v7, 0.0  ;;  %vm356_vm5 = vcmp.eq.s32.totalorder %v1828_v53, %v1842_v49  ;;  %v2194_v3 = vld [vmem:[#allocation12_spill] sm:$0xff]  ;;  %v2197_v8 = vld [vmem:[#allocation11_spill] sm:$0xff] }
 0x181   : > { %v415_v0 = vadd.f32 %v414_v46, %v383_v13  ;;  %vm359_vm6 = vcmp.eq.s32.totalorder %v1823_v16, %v1816_v9  ;;  %vm369_vm7 = vcmp.eq.s32.totalorder %v1801_v60, %v1910_v20  ;;  %vm370_vm8 = vcmp.eq.s32.totalorder %v1814_v57, %v1910_v20  ;;  %v1218_v18 = vpop.eup %1217 }
 0x182   : > { %731 = vadd.xlane.f32.xlu0 %v730_v15  ;;  %v734_v17 = vadd.f32 %v1216_v58, %v733_v25  ;;  %v387_v7 = vsel %vm355_vm4, %v1553_v14, 0.0  ;;  %vm363_vm9 = vcmp.eq.s32.totalorder %v1823_v16, %v1878_v11  ;;  %v429_v1 = vadd.f32 %v394_v62, %v393_v56  ;;  %v2201_v56 = vld [vmem:[#allocation19_spill] sm:$0xff]  ;;  %v2203_v15 = vld [vmem:[#allocation17_spill] sm:$0xff]  ;;  %v2204_v25 = vld [vmem:[#allocation20_spill] sm:$0xff] }
 0x183   : > { %v420_v24 = vadd.f32 %v419_v12, %v387_v7  ;;  %v424_v2 = vadd.f32 %v390_v44, %v389_v63  ;;  %v411_v36 = vadd.f32 %v410_v54, %v380_v23  ;;  %vm360_vm10 = vcmp.eq.s32.totalorder %v1828_v53, %v1816_v9  ;;  %v2200_v12 = vld [vmem:[#allocation16_spill] sm:$0xff]  ;;  %v522_v44 = vld [vmem:[#allocation3] sm:$0xff] }
 0x184   : > { %v735_v22 = vadd.f32 %v1218_v18, %v734_v17  ;;  %v391_v35 = vsel %vm359_vm6, %v1565_v19, 0.0  ;;  %v401_v4 = vsel %vm369_vm7, %v1607_v38, 0.0  ;;  %v402_v41 = vsel %vm370_vm8, %v1610_v39, 0.0  ;;  %v523_v23 = vld [vmem:[#allocation3 + $0x8] sm:$0xff] }
 0x185   : > { %v397_v14 = vsel %vm365_vm12, %v1589_v29, 0.0  ;;  %v398_v6 = vsel %vm366_vm13, %v1597_v33, 0.0  ;;  %v388_v19 = vsel %vm356_vm5, %v1569_v21, 0.0  ;;  %v416_v38 = vadd.f32 %v415_v0, %v384_v37  ;;  %v2206_v0 = vld [vmem:[#allocation21_spill] sm:$0xff]  ;;  %v2207_v17 = vld [vmem:[#allocation24_spill] sm:$0xff] }
 0x186   : > { %412 = vadd.xlane.f32.xlu0 %v411_v36  ;;  %736 = vadd.xlane.f32.xlu1 %v735_v22  ;;  %v395_v39 = vsel %vm363_vm9, %v1584_v27, 0.0  ;;  %vm367_vm11 = vcmp.eq.s32.totalorder %v1823_v16, %v1834_v31  ;;  %v421_v28 = vadd.f32 %v420_v24, %v388_v19  ;;  %vm364_vm12 = vcmp.eq.s32.totalorder %v1828_v53, %v1878_v11 }
 0x187   : > { %v430_v29 = vadd.f32 %v429_v1, %v395_v39  ;;  %v425_v45 = vadd.f32 %v424_v2, %v391_v35  ;;  %v392_v33 = vsel %vm360_vm10, %v1581_v26, 0.0  ;;  %vm371_vm13 = vcmp.eq.s32.totalorder %v1823_v16, %v1910_v20 }
 0x188   : > { %v439_v21 = vadd.f32 %v402_v41, %v401_v4  ;;  %v434_v49 = vadd.f32 %v398_v6, %v397_v14  ;;  %v399_v27 = vsel %vm367_vm11, %v1600_v34, 0.0  ;;  %v405_v52 = vsel %vm373_vm1, %v1618_v42, 0.0  ;;  %v524_v4 = vld [vmem:[#allocation3 + $0x10] sm:$0xff]  ;;  %v2209_v41 = vld [vmem:[#allocation22_spill] sm:$0xff] }
 0x189   : > { %v406_v11 = vsel %vm374_vm2, %v1621_v43, 0.0  ;;  %v396_v26 = vsel %vm364_vm12, %v1594_v32, 0.0  ;;  %vm368_vm14 = vcmp.eq.s32.totalorder %v1828_v53, %v1834_v31  ;;  %v426_v47 = vadd.f32 %v425_v45, %v392_v33  ;;  %v2210_v14 = vld [vmem:[#allocation25_spill] sm:$0xff]  ;;  %v2212_v33 = vld [vmem:[#allocation26_spill] sm:$0xff] }
 0x18a   : > { %422 = vadd.xlane.f32.xlu0 %v421_v28  ;;  %417 = vadd.xlane.f32.xlu1 %v416_v38  ;;  %v431_v9 = vadd.f32 %v430_v29, %v396_v26  ;;  %vm372_vm15 = vcmp.eq.s32.totalorder %v1828_v53, %v1910_v20  ;;  %v403_v34 = vsel %vm371_vm13, %v1613_v40, 0.0  ;;  %v435_v10 = vadd.f32 %v434_v49, %v399_v27  ;;  %v2198_v20 = vld [vmem:[#allocation14_spill] sm:$0xff] }
 0x18b   : > { %v440_v42 = vadd.f32 %v439_v21, %v403_v34  ;;  %vm375_vm1 = vcmp.eq.s32.totalorder %v1823_v16, %v1876_v5  ;;  %v444_v43 = vadd.f32 %v406_v11, %v405_v52  ;;  %v400_v57 = vsel %vm368_vm14, %v1629_v48, 0.0  ;;  %v525_v45 = vld [vmem:[#allocation3 + $0x18] sm:$0xff]  ;;  %v2213_v21 = vld [vmem:[#allocation28_spill] sm:$0xff] }
 0x18c   : > { %v404_v32 = vsel %vm372_vm15, %v1636_v51, 0.0  ;;  %v407_v31 = vsel %vm375_vm1, %v1633_v50, 0.0  ;;  %v436_v37 = vadd.f32 %v435_v10, %v400_v57  ;;  %vm376_vm2 = vcmp.eq.s32.totalorder %v1828_v53, %v1876_v5  ;;  %v2195_v51 = vld [vmem:[#allocation15_spill] sm:$0xff] }
 0x18d   : > { %v441_v13 = vadd.f32 %v440_v42, %v404_v32  ;;  %v445_v40 = vadd.f32 %v444_v43, %v407_v31  ;;  %v408_v46 = vsel %vm376_vm2, %v1642_v55, 0.0  ;;  %v2193_v48 = vsub.f32 %v1663_v59, %v1666_v61  ;;  %v527_v57 = vld [vmem:[#allocation3 + $0x28] sm:$0xff] }
 0x18e   : > { %432 = vadd.xlane.f32.xlu0 %v431_v9  ;;  %427 = vadd.xlane.f32.xlu1 %v426_v47  ;;  %v2196_v54 = vsub.f32 %v2194_v3, %v2195_v51  ;;  %v2199_v53 = vsub.f32 %v2197_v8, %v2198_v20  ;;  %v2202_v55 = vsub.f32 %v2200_v12, %v2201_v56  ;;  %v526_v9 = vld [vmem:[#allocation3 + $0x20] sm:$0xff] }
 0x18f   : > { %v446_v16 = vadd.f32 %v445_v40, %v408_v46  ;;  %v538_v30 = vmul.f32 1.442695, %v2193_v48  ;;  %v2205_v63 = vsub.f32 %v2203_v15, %v2204_v25  ;;  %v2208_v7 = vsub.f32 %v2206_v0, %v2207_v17 }
 0x190   : > { %v540_v50 = vmul.f32 1.442695, %v2196_v54  ;;  %v542_v5 = vmul.f32 1.442695, %v2199_v53  ;;  %v544_v62 = vmul.f32 1.442695, %v2202_v55  ;;  %v2211_v6 = vsub.f32 %v2209_v41, %v2210_v14 }
 0x191   : > { %1219 = vpow2.f32 %v538_v30  ;;  %v546_v59 = vmul.f32 1.442695, %v2205_v63  ;;  %v548_v18 = vmul.f32 1.442695, %v2208_v7  ;;  %v2214_v49 = vsub.f32 %v2212_v33, %v2213_v21  ;;  %v313_v53 = vld [vmem:[#allocation4] sm:$0xff]  ;;  %v314_v63 = vld [vmem:[#allocation4 + $0x8] sm:$0xff] }
 0x192   : > { %442 = vadd.xlane.f32.xlu0 %v441_v13  ;;  %437 = vadd.xlane.f32.xlu1 %v436_v37  ;;  %1221 = vpow2.f32 %v540_v50  ;;  %v550_v19 = vmul.f32 1.442695, %v2211_v6  ;;  %v529_v50 = vld [vmem:[#allocation3 + $0x38] sm:$0xff] }
 0x193   : > { %1223 = vpow2.f32 %v542_v5  ;;  %v552_v27 = vmul.f32 1.442695, %v2214_v49  ;;  %v766_v49 = vld [vmem:[#allocation2 + $0x8] sm:$0xff] }
 0x194   : > { %1225 = vpow2.f32 %v544_v62 }
 0x195   : > { %1227 = vpow2.f32 %v546_v59  ;;  %v315_v59 = vld [vmem:[#allocation4 + $0x10] sm:$0xff] }
 0x196   : > { %447 = vadd.xlane.f32.xlu1 %v446_v16  ;;  %1229 = vpow2.f32 %v548_v18  ;;  %v528_v16 = vld [vmem:[#allocation3 + $0x30] sm:$0xff] }
 0x197   : > { %1231 = vpow2.f32 %v550_v19 }
 0x198   : > { %1233 = vpow2.f32 %v552_v27  ;;  %v767_v27 = vld [vmem:[#allocation2 + $0x10] sm:$0xff] }
 0x19b   : > { %v1220_v61 = vpop.eup %1219 }
 0x19c   : > { %v1222_v58 = vpop.eup %1221  ;;  %v554_v24 = vmul.f32 %v1220_v61, %v522_v44 }
 0x19d   : > { %v555_v36 = vmul.f32 %v1222_v58, %v523_v23  ;;  %v1224_v22 = vpop.eup %1223 }
 0x19e   : > { %v556_v39 = vmul.f32 %v1224_v22, %v524_v4  ;;  %v1226_v28 = vpop.eup %1225 }
 0x19f   : > { %v1228_v11 = vpop.eup %1227  ;;  %v557_v26 = vmul.f32 %v1226_v28, %v525_v45 }
 0x1a0   : > { %v558_v42 = vmul.f32 %v1228_v11, %v526_v9  ;;  %v1230_v10 = vpop.eup %1229 }
 0x1a1   : > { %v559_v13 = vmul.f32 %v1230_v10, %v527_v57  ;;  %v1232_v40 = vpop.eup %1231 }
 0x1a2   : > { %v560_v3 = vmul.f32 %v1232_v40, %v528_v16  ;;  %v1234_v51 = vpop.eup %1233 }
 0x1a3   : > { %v561_v12 = vmul.f32 %v1234_v51, %v529_v50 }
 0x1f8   : > { %v702_v1 = vpop.xlane.xlu1 %701 }
 0x1f9   : > { %v738_v2 = vadd.f32 %v702_v1, %v554_v24  ;;  %v316_v24 = vld [vmem:[#allocation4 + $0x18] sm:$0xff]  ;;  %v317_v1 = vld [vmem:[#allocation4 + $0x20] sm:$0xff] }
 0x1fb   : > { %746 = vst.msk [vmem:[#allocation3] sm:$0xff] %vm233_vm0, %v738_v2 }
 0x1fc   : > { %v707_v35 = vpop.xlane.xlu0 %706 }
 0x1fd   : > { %v739_v38 = vadd.f32 %v707_v35, %v555_v36  ;;  %v765_v35 = vld [vmem:[#allocation2] sm:$0xff] }
 0x1ff   : > { %747 = vst.msk [vmem:[#allocation3 + $0x8] sm:$0xff] %vm233_vm0, %v739_v38  ;;  %v318_v38 = vld [vmem:[#allocation4 + $0x28] sm:$0xff] }
 0x200   : > { %v712_v29 = vpop.xlane.xlu0 %711 }
 0x201   : > { %v740_v52 = vadd.f32 %v712_v29, %v556_v39  ;;  %v319_v29 = vld [vmem:[#allocation4 + $0x30] sm:$0xff] }
 0x202   : > { %v773_v31 = vld [vmem:[#allocation3] sm:$0xff] }
 0x203   : > { %748 = vst.msk [vmem:[#allocation3 + $0x10] sm:$0xff] %vm233_vm0, %v740_v52  ;;  %1235 = vlog2.f32 %v773_v31  ;;  %v320_v31 = vld [vmem:[#allocation4 + $0x38] sm:$0xff] }
 0x204   : > { %v717_v47 = vpop.xlane.xlu1 %716 }
 0x205   : > { %v741_v34 = vadd.f32 %v717_v47, %v557_v26  ;;  %v2215_v26 = vld [vmem:[#allocation29_spill] sm:$0xff] }
 0x206   : > { %v774_v37 = vld [vmem:[#allocation3 + $0x8] sm:$0xff]  ;;  %vm821_vm3 = vcmp.ne.s32.totalorder %v2215_v26, 0  ;;  %v857_v26 = vmul.u32 16, %v1801_v60 }
 0x207   : > { %749 = vst.msk [vmem:[#allocation3 + $0x18] sm:$0xff] %vm233_vm0, %v741_v34  ;;  %v722_v43 = vpop.xlane.xlu0 %721  ;;  %1237 = vlog2.f32 %v774_v37 }
 0x208   : > { %v742_v32 = vadd.f32 %v722_v43, %v558_v42 }
 0x20a   : > { %750 = vst.msk [vmem:[#allocation3 + $0x20] sm:$0xff] %vm233_vm0, %v742_v32  ;;  %v775_v48 = vld [vmem:[#allocation3 + $0x10] sm:$0xff] }
 0x20b   : > { %v727_v46 = vpop.xlane.xlu1 %726  ;;  %1239 = vlog2.f32 %v775_v48  ;;  %v768_v48 = vld [vmem:[#allocation2 + $0x18] sm:$0xff] }
 0x20c   : > { %v743_v30 = vadd.f32 %v727_v46, %v559_v13 }
 0x20d   : > { %v1236_v25 = vpop.eup %1235 }
 0x20e   : > { %751 = vst.msk [vmem:[#allocation3 + $0x28] sm:$0xff] %vm233_vm0, %v743_v30  ;;  %v776_v8 = vld [vmem:[#allocation3 + $0x18] sm:$0xff]  ;;  %v782_v18 = vmul.f32 0.6931472, %v1236_v25 }
 0x20f   : > { %v732_v54 = vpop.xlane.xlu0 %731  ;;  %1241 = vlog2.f32 %v776_v8  ;;  %v2217_v25 = vld [vmem:[#allocation30_spill] sm:$0xff] }
 0x210   : > { %v744_v20 = vadd.f32 %v732_v54, %v560_v3  ;;  %v797_v39 = vadd.f32 %v782_v18, %v765_v35  ;;  %v2216_v3 = vld [vmem:[#allocation13_spill] sm:$0xff]  ;;  %v769_v54 = vld [vmem:[#allocation2 + $0x20] sm:$0xff]  ;;  %vm823_vm5 = vcmp.ne.s32.totalorder %v2217_v25, 0 }
 0x211   : > { %v777_v5 = vld [vmem:[#allocation3 + $0x20] sm:$0xff]  ;;  %v1238_v44 = vpop.eup %1237  ;;  %vm822_vm4 = vcmp.ne.s32.totalorder %v2216_v3, 0 }
 0x212   : > { %752 = vst.msk [vmem:[#allocation3 + $0x30] sm:$0xff] %vm233_vm0, %v744_v20  ;;  %1243 = vlog2.f32 %v777_v5  ;;  %v784_v4 = vmul.f32 0.6931472, %v1238_v44  ;;  %v2218_v44 = vld [vmem:[#allocation18_spill] sm:$0xff] }
 0x213   : > { %v737_v56 = vpop.xlane.xlu1 %736  ;;  %v413_v55 = vpop.xlane.xlu0 %412  ;;  %vm824_vm6 = vcmp.ne.s32.totalorder %v2218_v44, 0 }
 0x214   : > { %v745_v62 = vadd.f32 %v737_v56, %v561_v12  ;;  %v449_v15 = vadd.f32 %v413_v55, %v313_v53  ;;  %v798_v9 = vadd.f32 %v784_v4, %v766_v49  ;;  %v2222_v49 = vld [vmem:[#allocation27_spill] sm:$0xff] }
 0x215   : > { %v778_v61 = vld [vmem:[#allocation3 + $0x28] sm:$0xff]  ;;  %v1240_v0 = vpop.eup %1239  ;;  %vm828_vm9 = vcmp.ne.s32.totalorder %v2222_v49, 0 }
 0x216   : > { %753 = vst.msk [vmem:[#allocation3 + $0x38] sm:$0xff] %vm233_vm0, %v745_v62  ;;  %458 = vst.msk [vmem:[#allocation4] sm:$0xff] %vm233_vm0, %v449_v15  ;;  %1245 = vlog2.f32 %v778_v61  ;;  %v786_v41 = vmul.f32 0.6931472, %v1240_v0  ;;  %v771_v61 = vld [vmem:[#allocation2 + $0x30] sm:$0xff] }
 0x217   : > { %v418_v58 = vpop.xlane.xlu1 %417  ;;  %v423_v23 = vpop.xlane.xlu0 %422 }
 0x218   : > { %v450_v17 = vadd.f32 %v418_v58, %v314_v63  ;;  %v451_v7 = vadd.f32 %v423_v23, %v315_v59  ;;  %v799_v47 = vadd.f32 %v786_v41, %v767_v27  ;;  %v770_v58 = vld [vmem:[#allocation2 + $0x28] sm:$0xff]  ;;  %v772_v41 = vld [vmem:[#allocation2 + $0x38] sm:$0xff] }
 0x219   : > { %v779_v2 = vld [vmem:[#allocation3 + $0x30] sm:$0xff]  ;;  %v1242_v14 = vpop.eup %1241 }
 0x21a   : > { %459 = vst.msk [vmem:[#allocation4 + $0x8] sm:$0xff] %vm233_vm0, %v450_v17  ;;  %460 = vst.msk [vmem:[#allocation4 + $0x10] sm:$0xff] %vm233_vm0, %v451_v7  ;;  %1247 = vlog2.f32 %v779_v2  ;;  %v788_v34 = vmul.f32 0.6931472, %v1242_v14  ;;  %v2219_v14 = vld [vmem:[#allocation31_spill] sm:$0xff] }
 0x21b   : > { %v428_v36 = vpop.xlane.xlu1 %427  ;;  %v433_v22 = vpop.xlane.xlu0 %432 }
 0x21c   : > { %v452_v6 = vadd.f32 %v428_v36, %v316_v24  ;;  %v453_v19 = vadd.f32 %v433_v22, %v317_v1  ;;  %v1244_v28 = vpop.eup %1243  ;;  %v800_v51 = vadd.f32 %v788_v34, %v768_v48  ;;  %v866_v34 = vadd.s32 16, %v857_v26 }
 0x21d   : > { %v805_v45 = vld [vmem:[#allocation4] sm:$0xff]  ;;  %v780_v33 = vld [vmem:[#allocation3 + $0x38] sm:$0xff]  ;;  %v790_v57 = vmul.f32 0.6931472, %v1244_v28 }
 0x21e   : > { %461 = vst.msk [vmem:[#allocation4 + $0x18] sm:$0xff] %vm233_vm0, %v452_v6  ;;  %462 = vst.msk [vmem:[#allocation4 + $0x20] sm:$0xff] %vm233_vm0, %v453_v19  ;;  %v813_v21 = vsub.f32 %v805_v45, %v797_v39  ;;  %1249 = vlog2.f32 %v780_v33  ;;  %v2220_v6 = vld [vmem:[#allocation23_spill] sm:$0xff] }
 0x21f   : > { %v438_v52 = vpop.xlane.xlu1 %437  ;;  %v443_v11 = vpop.xlane.xlu0 %442  ;;  %v801_v53 = vadd.f32 %v790_v57, %v769_v54  ;;  %vm826_vm7 = vcmp.ne.s32.totalorder %v2220_v6, 0 }
 0x220   : > { %v454_v42 = vadd.f32 %v438_v52, %v318_v38  ;;  %v455_v10 = vadd.f32 %v443_v11, %v319_v29  ;;  %v829_v43 = vsub.f32 0.0, %v813_v21  ;;  %v1246_v32 = vpop.eup %1245  ;;  %v2221_v21 = vld [vmem:[#allocation32_spill] sm:$0xff] }
 0x221   : > { %v806_v13 = vld [vmem:[#allocation4 + $0x8] sm:$0xff]  ;;  %v807_v37 = vld [vmem:[#allocation4 + $0x10] sm:$0xff]  ;;  %v792_v5 = vmul.f32 0.6931472, %v1246_v32  ;;  %vm827_vm8 = vcmp.ne.s32.totalorder %v2221_v21, 0 }
 0x222   : > { %463 = vst.msk [vmem:[#allocation4 + $0x28] sm:$0xff] %vm233_vm0, %v454_v42  ;;  %464 = vst.msk [vmem:[#allocation4 + $0x30] sm:$0xff] %vm233_vm0, %v455_v10  ;;  %v837_v40 = vsel %vm821_vm3, %v829_v43, 0.0  ;;  %v814_v46 = vsub.f32 %v806_v13, %v798_v9  ;;  %v815_v16 = vsub.f32 %v807_v37, %v799_v47  ;;  %v2223_v9 = vlaneseq }
 0x223   : > { %v448_v30 = vpop.xlane.xlu1 %447  ;;  %885 = vperm.xlu0 %1153, %v837_v40   ;;  %v802_v7 = vadd.f32 %v792_v5, %v770_v58 }
 0x224   : > { %v1248_v50 = vpop.eup %1247  ;;  %v456_v8 = vadd.f32 %v448_v30, %v320_v31  ;;  %v830_v20 = vsub.f32 0.0, %v814_v46  ;;  %v831_v12 = vsub.f32 0.0, %v815_v16  ;;  %v846_v47 = vshrl.u32 %v2223_v9, 7 }
 0x225   : > { %v808_v56 = vld [vmem:[#allocation4 + $0x18] sm:$0xff]  ;;  %v809_v55 = vld [vmem:[#allocation4 + $0x20] sm:$0xff]  ;;  %v794_v62 = vmul.f32 0.6931472, %v1248_v50 }
 0x226   : > { %465 = vst.msk [vmem:[#allocation4 + $0x38] sm:$0xff] %vm233_vm0, %v456_v8  ;;  %v838_v15 = vsel %vm822_vm4, %v830_v20, 0.0  ;;  %v816_v63 = vsub.f32 %v808_v56, %v800_v51  ;;  %v817_v59 = vsub.f32 %v809_v55, %v801_v53  ;;  %v839_v18 = vsel %vm823_vm5, %v831_v12, 0.0 }
 0x227   : > { %890 = vperm.xlu1 %1154, %v838_v15   ;;  %v803_v23 = vadd.f32 %v794_v62, %v771_v61  ;;  %vm825_vm0 = vcmp.ne.s32.totalorder %v2219_v14, 0  ;;  %v847_v42 = vadd.s32 8, %v846_v47  ;;  %vm858_vm10 = vcmp.ge.s32.totalorder %v846_v47, %v857_v26 }
 0x228   : > { %v1250_v0 = vpop.eup %1249  ;;  %v832_v17 = vsub.f32 0.0, %v816_v63  ;;  %v833_v22 = vsub.f32 0.0, %v817_v59  ;;  %vm867_vm11 = vcmp.lt.s32.totalorder %v846_v47, %v866_v34  ;;  %v848_v10 = vadd.s32 16, %v846_v47 }
 0x229   : > { %v810_v24 = vld [vmem:[#allocation4 + $0x28] sm:$0xff]  ;;  %v811_v1 = vld [vmem:[#allocation4 + $0x30] sm:$0xff]  ;;  %v796_v2 = vmul.f32 0.6931472, %v1250_v0  ;;  %vm859_vm12 = vcmp.ge.s32.totalorder %v847_v42, %v857_v26  ;;  %vm868_vm13 = vcmp.lt.s32.totalorder %v847_v42, %v866_v34  ;;  %v849_v43 = vadd.s32 24, %v846_v47  ;;  %vm2046_vm14 = vmand %vm858_vm10, %vm867_vm11 }
 0x22a   : > { %v840_v36 = vsel %vm824_vm6, %v832_v17, 0.0  ;;  %v818_v35 = vsub.f32 %v810_v24, %v802_v7  ;;  %v819_v4 = vsub.f32 %v811_v1, %v803_v23  ;;  %v841_v28 = vsel %vm825_vm0, %v833_v22, 0.0  ;;  %vm876_vm15 = vmand %vm859_vm12, %vm868_vm13 }
 0x22b   : > { %895 = vperm.xlu1 %1154, %v839_v18   ;;  %900 = vperm.xlu0 %1153, %v840_v36   ;;  %v804_v19 = vadd.f32 %v796_v2, %v772_v41  ;;  %vm860_vm1 = vcmp.ge.s32.totalorder %v848_v10, %v857_v26  ;;  %vm869_vm2 = vcmp.lt.s32.totalorder %v848_v10, %v866_v34  ;;  %v850_v31 = vadd.s32 32, %v846_v47 }
 0x22c   : > { %v834_v38 = vsub.f32 0.0, %v818_v35  ;;  %v835_v45 = vsub.f32 0.0, %v819_v4  ;;  %vm861_vm3 = vcmp.ge.s32.totalorder %v849_v43, %v857_v26  ;;  %vm870_vm4 = vcmp.lt.s32.totalorder %v849_v43, %v866_v34  ;;  %vm2052_vm6 = vmand %vm860_vm1, %vm869_vm2 }
 0x22d   : > { %v812_v39 = vld [vmem:[#allocation4 + $0x38] sm:$0xff]  ;;  %v851_v60 = vadd.s32 40, %v846_v47  ;;  %vm931_vm5 = vcmask 31744   ;;  %vm2057_vm0 = vmand %vm861_vm3, %vm870_vm4  ;;  %v852_v30 = vadd.s32 48, %v846_v47  ;;  %v853_v3 = vadd.s32 56, %v846_v47 }
 0x22e   : > { %v842_v29 = vsel %vm826_vm7, %v834_v38, 0.0  ;;  %v820_v33 = vsub.f32 %v812_v39, %v804_v19  ;;  %v843_v52 = vsel %vm827_vm8, %v835_v45, 0.0  ;;  %vm862_vm7 = vcmp.ge.s32.totalorder %v850_v31, %v857_v26 }
 0x22f   : > { %905 = vperm.xlu1 %1154, %v841_v28   ;;  %910 = vperm.xlu0 %1153, %v842_v29   ;;  %vm871_vm8 = vcmp.lt.s32.totalorder %v850_v31, %v866_v34  ;;  %vm872_vm10 = vcmp.lt.s32.totalorder %v851_v60, %v866_v34  ;;  %vm864_vm13 = vcmp.ge.s32.totalorder %v852_v30, %v857_v26  ;;  %vm953_vm4 = vcmask 24576  }
 0x230   : > { %v836_v27 = vsub.f32 0.0, %v820_v33  ;;  %vm2066_vm11 = vmand %vm862_vm7, %vm871_vm8  ;;  %vm874_vm1 = vcmp.lt.s32.totalorder %v853_v3, %v866_v34 }
 0x232   : > { %v844_v11 = vsel %vm828_vm9, %v836_v27, 0.0  ;;  %vm863_vm9 = vcmp.ge.s32.totalorder %v851_v60, %v857_v26 }
 0x233   : > { %915 = vperm.xlu1 %1154, %v843_v52   ;;  %920 = vperm.xlu0 %1153, %v844_v11   ;;  %vm2071_vm12 = vmand %vm863_vm9, %vm872_vm10 }
 0x2a2   : > { %v886_v32 = vpop.permute.xlu0 %885 }
 0x2a3   : > { %v923_v37 = vsel %vm2046_vm14, %v886_v32, 0.0  ;;  %vm873_vm14 = vcmp.lt.s32.totalorder %v852_v30, %v866_v34 }
 0x2a4   : > { %v932_v51 = vsel %vm931_vm5, %v923_v37, 0.0  ;;  %vm881_vm2 = vmand %vm864_vm13, %vm873_vm14 }
 0x2a6   : > { %v891_v13 = vpop.permute.xlu1 %890 }
 0x2a7   : > { %v924_v40 = vsel %vm876_vm15, %v891_v13, 0.0  ;;  %vm865_vm15 = vcmp.ge.s32.totalorder %v853_v3, %v857_v26 }
 0x2a8   : > { %v933_v16 = vsel %vm931_vm5, %v924_v40, 0.0  ;;  %vm882_vm3 = vmand %vm865_vm15, %vm874_vm1 }
 0x2a9   : > { %v934_v8 = vadd.f32 %v933_v16, %v932_v51 }
 0x2aa   : > { %v896_v54 = vpop.permute.xlu1 %895  ;;  %v901_v50 = vpop.permute.xlu0 %900 }
 0x2ab   : > { %v925_v20 = vsel %vm2052_vm6, %v896_v54, 0.0  ;;  %v926_v53 = vsel %vm2057_vm0, %v901_v50, 0.0 }
 0x2ac   : > { %v935_v12 = vsel %vm931_vm5, %v925_v20, 0.0  ;;  %v937_v62 = vsel %vm931_vm5, %v926_v53, 0.0 }
 0x2ad   : > { %v936_v55 = vadd.f32 %v935_v12, %v934_v8 }
 0x2ae   : > { %v906_v15 = vpop.permute.xlu1 %905  ;;  %v911_v25 = vpop.permute.xlu0 %910 }
 0x2af   : > { %v938_v63 = vadd.f32 %v937_v62, %v936_v55  ;;  %v927_v59 = vsel %vm2066_vm11, %v906_v15, 0.0  ;;  %v928_v61 = vsel %vm2071_vm12, %v911_v25, 0.0 }
 0x2b0   : > { %v939_v44 = vsel %vm931_vm5, %v927_v59, 0.0  ;;  %v941_v23 = vsel %vm931_vm5, %v928_v61, 0.0 }
 0x2b1   : > { %v940_v58 = vadd.f32 %v939_v44, %v938_v63 }
 0x2b2   : > { %v916_v0 = vpop.permute.xlu1 %915  ;;  %v921_v17 = vpop.permute.xlu0 %920 }
 0x2b3   : > { %v942_v7 = vadd.f32 %v941_v23, %v940_v58  ;;  %v929_v18 = vsel %vm881_vm2, %v916_v0, 0.0  ;;  %v930_v24 = vsel %vm882_vm3, %v921_v17, 0.0 }
 0x2b4   : > { %v943_v1 = vsel %vm931_vm5, %v929_v18, 0.0  ;;  %v945_v36 = vsel %vm931_vm5, %v930_v24, 0.0 }
 0x2b5   : > { %v944_v2 = vadd.f32 %v943_v1, %v942_v7 }
 0x2b7   : > { %v946_v22 = vadd.f32 %v945_v36, %v944_v2 }
 0x2b9   : > { %v947_v35 = vrot.slane %v946_v22, 4 }
 0x2bb   : > { %v948_v4 = vadd.f32 %v947_v35, %v946_v22 }
 0x2bd   : > { %v949_v41 = vrot.slane %v948_v4, 2 }
 0x2bf   : > { %v950_v14 = vadd.f32 %v949_v41, %v948_v4 }
 0x2c1   : > { %v951_v6 = vrot.slane %v950_v14, 1 }
 0x2c3   : > { %v952_v19 = vadd.f32 %v951_v6, %v950_v14 }
 0x2c5   : > { %954 = vst.msk [vmem:[%s216_s18] sm:$0x1] %vm953_vm4, %v952_v19 }
 0x2c6   : > { %1294 = shalt.err (!%p1291_p4)
}
 0x2c7   : > { %s1295_s3 = scalar_lea.hbm %s2089_s26, 16  ;;  %s1299_s21 = scalar_lea.hbm %s2140_s2, 32 }
 0x2c8   : > { %p1296_p7 = scmp.ne.s32.totalorder %s2089_s26, %s1295_s3  ;;  %p1300_p1 = scmp.lt.u32.totalorder %s2089_s26, %s2140_s2 }
 0x2c9   : > { %p1301_p3 = scmp.lt.u32.totalorder %s1299_s21, %s1295_s3  ;;  %p1303_p9 = scmp.lt.u32.totalorder %s1295_s3, %s2089_s26 }
 0x2ca   : > { %p1297_p10 = pnand %p1296_p7, %p2234_p11 }
 0x2cb   : > { %p1302_p8 = por %p1301_p3, %p1300_p1 }
 0x2cc   : > { %p1298_p12 = pneg %p1297_p10 }
 0x2cd   : > { %p1304_p0 = por %p1303_p9, %p1302_p8 }
 0x2cf   : > { %p1305_p6 = pnand %p1304_p0, %p1298_p12 }
 0x2d1   : > { %1308 = shalt.err (!%p1305_p6)
}
 0x2d2   : > { %1088 = dma.vmem_to_hbm [thread:$0]  (%p2234_p11), %s2091_s19, 16, %s2089_s26, %s956_s27  }
 0x2d3 PF: > { %s981_s5 = sand.u32 1, %s1343_s9   ;;  %p2235_p13 = scmp.ne.s32.totalorder %s2168_s24, 0 }
 0x2d4   : > { %p2236_p2 = scmp.ge.s32.totalorder %s1363_s14, 2  ;;  %s982_s6 = scalar_lea.sflag [#allocation7], %s981_s5 }
 0x2d6   : > { %p1095_p5 = pnand %p2236_p2, %p2235_p13 }
 0x2d8   : > { %1338 = dma.done.wait (!%p1095_p5), %s982_s6, 16  }
 0x2d9   : > { %1340 = vsyncadd (!%p1095_p5), %s982_s6, 4294967280  ;;  %s18_s14 = sadd.s32 1, %s1363_s14   ;;  %s2237_s9 = smov %s1347_s10 }
 0x2da   : > { %p15_p4 = scmp.ge.s32.totalorder %s18_s14, 4   ;;  %s2238_s10 = smov %s1351_s11 }
 0x2db   : > { %s2239_s11 = smov %s1443_s23  ;;  %s2240_s12 = smov %s1359_s13 }
 0x2dc   : > { %s2241_s13 = smov %s2243_s17  ;;  %17 = sbr.rel (!%p15_p4) target bundleno = 6 (0x6), region = 84 }
 0x2e3   :  { %986 = vsyncpa [#allocation6], 1 }
 0x2e4   :  { %988 = vsyncpa [#allocation6 + $0x1], 1 }
 0x2e5   :  { %989 = vsyncpa [#allocation7], 1 }
 0x2e6   :  { %991 = vsyncpa [#allocation7 + $0x1], 1 }

</bundles_post_ra>
